<compile_context>
chip_gen: v5e
topology: v5e:2x2
jax: 0.10.0
libtpu: 0.0.40
codegen_flags: <defaults>
</compile_context>

<pallas_src>
import jax
import jax.numpy as jnp
from jax import lax
from jax.experimental import pallas as pl
from jax.experimental.pallas import tpu as pltpu

# ---- module hyperparameters (from the PyTorch source) ----
BLOCK_SIZE = 32 * 4               # 128 (max context; only tril[:T,:T] is used)
N_EMBD = 64 * 3                   # 192
NUM_HEADS = 6
HEAD_SIZE = N_EMBD // NUM_HEADS   # 32  -> concat of heads is n_embd wide
# dropout = 0.0 -> identity, omitted.


# ---------------- Pallas kernel ----------------

def _mha_fused_kernel(x_ref, wqkv_ref, bqkv_ref, wproj_ref, bproj_ref, o_ref):
    """One block of Bb batch elements: fused QKV projection, all heads'
    causal attention, and the output projection (head concat folded into
    per-head accumulation) — all in VMEM, no HBM round trip."""
    Bb, T, C = x_ref.shape
    BT = Bb * T

    # Fused QKV projection for the whole (Bb*T, C) slab on the MXU in bf16,
    # f32 accumulate.  The C**-0.5 score scale is pre-folded into Q cols/bias.
    xb = x_ref[...].reshape(BT, C).astype(jnp.bfloat16)
    qkv = jnp.dot(xb, wqkv_ref[...], preferred_element_type=jnp.float32)
    qkv = qkv + bqkv_ref[...]                          # (BT, 3C) f32
    qkv = qkv.reshape(Bb, T, 3 * C)

    # Causal mask built once per kernel invocation (broadcasts over Bb).
    row = lax.broadcasted_iota(jnp.int32, (T, T), 0)
    col = lax.broadcasted_iota(jnp.int32, (T, T), 1)
    causal = col <= row
    neg_big = jnp.float32(-1e30)                       # finite guard vs -inf

    # Output accumulator (f32).  Head concat is folded into the projection:
    # y += head_out_h @ W_proj[h*hs:(h+1)*hs, :].
    y = jnp.zeros((BT, C), jnp.float32)

    for h in range(NUM_HEADS):                         # static unrolled loop
        lo = h * HEAD_SIZE
        q = qkv[:, :, lo:lo + HEAD_SIZE].astype(jnp.bfloat16)            # pre-scaled
        k = qkv[:, :, C + lo:C + lo + HEAD_SIZE].astype(jnp.bfloat16)
        v = qkv[:, :, 2 * C + lo:2 * C + lo + HEAD_SIZE].astype(jnp.bfloat16)

        # Batched q @ k^T over the Bb block (contract last dims, no transpose).
        s = jnp.einsum('btd,bsd->bts', q, k,
                       preferred_element_type=jnp.float32)               # (Bb,T,T) f32
        s = jnp.where(causal, s, neg_big)
        s = s - jnp.max(s, axis=-1, keepdims=True)
        p = jnp.exp(s)
        denom = jnp.sum(p, axis=-1, keepdims=True)
        p = p * pl.reciprocal(denom, approx=True)      # EUP, off the VPU path

        ho = jnp.einsum('bts,bsd->btd', p.astype(jnp.bfloat16), v,
                        preferred_element_type=jnp.float32)              # (Bb,T,hs)
        y = y + jnp.dot(ho.reshape(BT, HEAD_SIZE).astype(jnp.bfloat16),
                        wproj_ref[h],                                    # (hs, C) bf16
                        preferred_element_type=jnp.float32)

    y = y + bproj_ref[...]                             # f32 bias add
    o_ref[...] = y.reshape(Bb, T, C).astype(o_ref.dtype)   # lane-dense 192-wide store


# ---------------- wrappers ----------------

def _choose_batch_block(B, T, C):
    """Batch elements per grid step.  ~10*T*C*4 bytes of live VMEM per batch
    element (activations + double-buffered I/O, generous); keep the per-step
    slab under ~8 MiB so the 16 MiB scoped default on v5e is never an issue,
    and keep the grid length >= 2 so v7x's two TensorCores both get work."""
    per_b = 10 * T * C * 4
    bb = max(1, min(B, (8 << 20) // per_b))
    if B >= 2:
        bb = min(bb, max(1, B // 2))
    while B % bb:                       # avoid a ragged trailing block
        bb -= 1
    return bb


def multi_head_attention(x, kparams):
    """x: (B, T, C) float32.  kparams: fused weights from prep_kernel_params."""
    B, T, C = x.shape
    assert C == N_EMBD and T <= BLOCK_SIZE

    # Pad T to a sublane multiple so in-kernel (Bb,T)->(Bb*T) reshapes are free.
    T_pad = ((T + 7) // 8) * 8
    xp = x if T_pad == T else jnp.pad(x, ((0, 0), (0, T_pad - T), (0, 0)))
    Bb = _choose_batch_block(B, T_pad, C)

    out = pl.pallas_call(
        _mha_fused_kernel,
        out_shape=jax.ShapeDtypeStruct((B, T_pad, C), x.dtype),
        grid_spec=pltpu.PrefetchScalarGridSpec(
            num_scalar_prefetch=0,
            grid=(B // Bb,),
            in_specs=[
                pl.BlockSpec((Bb, T_pad, C), lambda b: (b, 0, 0)),             # x
                pl.BlockSpec((C, 3 * C), lambda b: (0, 0)),                    # W_qkv (bf16)
                pl.BlockSpec((1, 3 * C), lambda b: (0, 0)),                    # b_qkv (f32)
                pl.BlockSpec((NUM_HEADS, HEAD_SIZE, C), lambda b: (0, 0, 0)),  # W_proj (bf16)
                pl.BlockSpec((1, C), lambda b: (0, 0)),                        # b_proj (f32)
            ],
            out_specs=pl.BlockSpec((Bb, T_pad, C), lambda b: (b, 0, 0)),
        ),
        compiler_params=pltpu.CompilerParams(
            dimension_semantics=("parallel",)),        # batch blocks across TCs (v7x)
    )(xp, kparams["w_qkv"], kparams["b_qkv"], kparams["w_proj"], kparams["b_proj"])

    return out if T_pad == T else out[:, :T, :]


def init_params(key, num_heads=NUM_HEADS, head_size=HEAD_SIZE, n_embd=N_EMBD):
    """Deterministic init mimicking PyTorch nn.Linear (uniform ±1/sqrt(fan_in)),
    stored in the 'logical' per-head layout (used by the reference)."""
    ks = jax.random.split(key, 8)
    lim = 1.0 / (n_embd ** 0.5)

    def u(k, shape):
        return jax.random.uniform(k, shape, jnp.float32, -lim, lim)

    return {
        "wq": u(ks[0], (num_heads, n_embd, head_size)),
        "wk": u(ks[1], (num_heads, n_embd, head_size)),
        "wv": u(ks[2], (num_heads, n_embd, head_size)),
        "bq": u(ks[3], (num_heads, 1, head_size)),
        "bk": u(ks[4], (num_heads, 1, head_size)),
        "bv": u(ks[5], (num_heads, 1, head_size)),
        "w_proj": u(ks[6], (n_embd, n_embd)),
        "b_proj": u(ks[7], (1, n_embd)),
    }


def prep_kernel_params(params):
    """Stack per-head QKV weights into one (C, 3*C) matrix (head h occupies
    columns [h*hs, (h+1)*hs) within each Q/K/V block), fold the PyTorch
    C**-0.5 attention scale into the Q weight/bias, split W_proj into per-head
    (hs, C) row blocks, and cast the matmul weights to bf16."""
    H, C, hs = params["wq"].shape
    scale = jnp.float32(C) ** -0.5        # NOTE: n_embd**-0.5, as in the PyTorch source

    def flat_w(w):   # (H, C, hs) -> (C, H*hs)
        return jnp.transpose(w, (1, 0, 2)).reshape(C, H * hs)

    def flat_b(b):   # (H, 1, hs) -> (1, H*hs)
        return b.reshape(1, H * hs)

    w_qkv = jnp.concatenate(
        [flat_w(params["wq"]) * scale, flat_w(params["wk"]), flat_w(params["wv"])], axis=1)
    b_qkv = jnp.concatenate(
        [flat_b(params["bq"]) * scale, flat_b(params["bk"]), flat_b(params["bv"])], axis=1)
    w_proj_heads = params["w_proj"].reshape(H, hs, C)   # rows h*hs:(h+1)*hs -> head h

    return {"w_qkv": w_qkv.astype(jnp.bfloat16),
            "b_qkv": b_qkv,                              # biases stay f32
            "w_proj": w_proj_heads.astype(jnp.bfloat16),
            "b_proj": params["b_proj"]}


def _reference(x, params):
    """Pure-JAX reference replicating the PyTorch forward (dropout=0)."""
    B, T, C = x.shape
    outs = []
    for h in range(params["wq"].shape[0]):
        q = x @ params["wq"][h] + params["bq"][h]
        k = x @ params["wk"][h] + params["bk"][h]
        v = x @ params["wv"][h] + params["bv"][h]
        w = (q @ jnp.swapaxes(k, -2, -1)) * (C ** -0.5)
        mask = jnp.tril(jnp.ones((T, T), bool))
        w = jnp.where(mask, w, -jnp.inf)
        w = jax.nn.softmax(w, axis=-1)
        outs.append(w @ v)
    cat = jnp.concatenate(outs, axis=-1)
    return cat @ params["w_proj"] + params["b_proj"]


if __name__ == "__main__":
    key = jax.random.PRNGKey(0)
    k_par, k_x1, k_x2 = jax.random.split(key, 3)

    params = init_params(k_par)
    kparams = prep_kernel_params(params)

    # small shapes consistent with the module (channel dim fixed at n_embd=192)
    B, T = 2, 8
    x = jax.random.normal(k_x1, (B, T, N_EMBD), jnp.float32)
    out = jax.block_until_ready(multi_head_attention(x, kparams))
    ref = _reference(x, params)
    assert out.shape == (B, T, N_EMBD)
    # tolerance covers bf16 MXU operands + approx (EUP) reciprocal in softmax
    assert jnp.allclose(out, ref, atol=3e-2, rtol=3e-2), "mismatch vs reference (B=2,T=8)"

    # second config exercising the multi-batch-per-grid-step path (Bb > 1)
    B2, T2 = 8, 32
    x2 = jax.random.normal(k_x2, (B2, T2, N_EMBD), jnp.float32)
    out2 = jax.block_until_ready(multi_head_attention(x2, kparams))
    ref2 = _reference(x2, params)
    assert out2.shape == (B2, T2, N_EMBD)
    assert jnp.allclose(out2, ref2, atol=3e-2, rtol=3e-2), "mismatch vs reference (B=8,T=32)"

    print("KERNEL_OK")
</pallas_src>

<mosaic_0001>
module attributes {stable_mosaic.version = 11 : i64} {
  func.func @_mha_fused_kernel(%arg0: i32, %arg1: memref<1x8x192xf32, #tpu.memory_space<vmem>>, %arg2: memref<192x576xbf16, #tpu.memory_space<vmem>>, %arg3: memref<1x576xf32, #tpu.memory_space<vmem>>, %arg4: memref<6x32x192xbf16, #tpu.memory_space<vmem>>, %arg5: memref<1x192xf32, #tpu.memory_space<vmem>>, %arg6: memref<1x8x192xf32, #tpu.memory_space<vmem>>) attributes {dimension_semantics = [#tpu.dimension_semantics<parallel>], iteration_bounds = array<i64: 2>, scalar_prefetch = 0 : i64, scratch_operands = 0 : i64, tpu.core_type = #tpu.core_type<tc>, window_params = [{transform_indices = @transform_0, window_bounds = array<i64: 1, 8, 192>}, {pipeline_mode = #tpu.pipeline_mode<synchronous>, transform_indices = @transform_1, window_bounds = array<i64: 192, 576>}, {pipeline_mode = #tpu.pipeline_mode<synchronous>, transform_indices = @transform_2, window_bounds = array<i64: 1, 576>}, {pipeline_mode = #tpu.pipeline_mode<synchronous>, transform_indices = @transform_3, window_bounds = array<i64: 6, 32, 192>}, {pipeline_mode = #tpu.pipeline_mode<synchronous>, transform_indices = @transform_4, window_bounds = array<i64: 1, 192>}, {transform_indices = @transform_5, window_bounds = array<i64: 1, 8, 192>}]} {
    %c0 = arith.constant 0 : index
    %c0_0 = arith.constant 0 : index
    %c0_1 = arith.constant 0 : index
    %0 = vector.load %arg1[%c0, %c0_0, %c0_1] : memref<1x8x192xf32, #tpu.memory_space<vmem>>, vector<1x8x192xf32>
    %1 = vector.shape_cast %0 : vector<1x8x192xf32> to vector<8x192xf32>
    %2 = arith.truncf %1 : vector<8x192xf32> to vector<8x192xbf16>
    %c0_2 = arith.constant 0 : index
    %c0_3 = arith.constant 0 : index
    %3 = vector.load %arg2[%c0_2, %c0_3] : memref<192x576xbf16, #tpu.memory_space<vmem>>, vector<192x576xbf16>
    %cst = arith.constant dense<0.000000e+00> : vector<8x576xf32>
    %4 = tpu.matmul %2, %3, %cst {dimension_numbers = #tpu.dot_dimension_numbers<[1], [0], [0], [1], [0, 0, 1, 1], [], []>} : vector<8x192xbf16>, vector<192x576xbf16>, vector<8x576xf32> -> vector<8x576xf32>
    %c0_4 = arith.constant 0 : index
    %c0_5 = arith.constant 0 : index
    %5 = vector.load %arg3[%c0_4, %c0_5] : memref<1x576xf32, #tpu.memory_space<vmem>>, vector<1x576xf32>
    %6 = vector.broadcast %5 : vector<1x576xf32> to vector<8x576xf32>
    %7 = arith.addf %4, %6 : vector<8x576xf32>
    %8 = vector.shape_cast %7 : vector<8x576xf32> to vector<1x8x576xf32>
    %9 = tpu.iota {dimensions = array<i32: 0>} : vector<8x8xi32>
    %10 = tpu.iota {dimensions = array<i32: 1>} : vector<8x8xi32>
    %11 = arith.cmpi sle, %10, %9 : vector<8x8xi32>
    %cst_6 = arith.constant 0.000000e+00 : f32
    %12 = vector.broadcast %cst_6 : f32 to vector<8x192xf32>
    %13 = vector.extract_strided_slice %8 {offsets = [0, 0, 0], sizes = [1, 8, 32], strides = [1, 1, 1]} : vector<1x8x576xf32> to vector<1x8x32xf32>
    %14 = arith.truncf %13 : vector<1x8x32xf32> to vector<1x8x32xbf16>
    %15 = vector.extract_strided_slice %8 {offsets = [0, 0, 192], sizes = [1, 8, 32], strides = [1, 1, 1]} : vector<1x8x576xf32> to vector<1x8x32xf32>
    %16 = arith.truncf %15 : vector<1x8x32xf32> to vector<1x8x32xbf16>
    %17 = vector.extract_strided_slice %8 {offsets = [0, 0, 384], sizes = [1, 8, 32], strides = [1, 1, 1]} : vector<1x8x576xf32> to vector<1x8x32xf32>
    %18 = arith.truncf %17 : vector<1x8x32xf32> to vector<1x8x32xbf16>
    "tpu.trace_start"() <{level = 10 : i32, message = "btd,bsd->bts"}> : () -> ()
    %cst_7 = arith.constant dense<0.000000e+00> : vector<1x8x8xf32>
    %19 = tpu.matmul %14, %16, %cst_7 {dimension_numbers = #tpu.dot_dimension_numbers<[2], [2], [1], [1], [0, 0, 0, 1, 1, 1], [0], [0]>} : vector<1x8x32xbf16>, vector<1x8x32xbf16>, vector<1x8x8xf32> -> vector<1x8x8xf32>
    %cst_8 = arith.constant -1.000000e+30 : f32
    "tpu.trace_stop"() : () -> ()
    %20 = vector.shape_cast %11 : vector<8x8xi1> to vector<1x8x8xi1>
    %21 = vector.broadcast %cst_8 : f32 to vector<1x8x8xf32>
    %22 = arith.select %20, %19, %21 : vector<1x8x8xi1>, vector<1x8x8xf32>
    %cst_9 = arith.constant dense<0xFF800000> : vector<1x8xf32>
    %23 = vector.multi_reduction <maximumf>, %22, %cst_9 [2] : vector<1x8x8xf32> to vector<1x8xf32>
    %24 = vector.shape_cast %23 : vector<1x8xf32> to vector<1x8x1xf32>
    %25 = vector.broadcast %24 : vector<1x8x1xf32> to vector<1x8x8xf32>
    %26 = arith.subf %22, %25 : vector<1x8x8xf32>
    %27 = math.exp %26 : vector<1x8x8xf32>
    %cst_10 = arith.constant dense<0.000000e+00> : vector<1x8xf32>
    %28 = vector.multi_reduction <add>, %27, %cst_10 [2] : vector<1x8x8xf32> to vector<1x8xf32>
    %29 = vector.shape_cast %28 : vector<1x8xf32> to vector<1x8x1xf32>
    %30 = tpu.reciprocal %29 {approx = true} : vector<1x8x1xf32> -> vector<1x8x1xf32>
    %31 = vector.broadcast %30 : vector<1x8x1xf32> to vector<1x8x8xf32>
    %32 = arith.mulf %27, %31 : vector<1x8x8xf32>
    %33 = arith.truncf %32 : vector<1x8x8xf32> to vector<1x8x8xbf16>
    "tpu.trace_start"() <{level = 10 : i32, message = "bts,bsd->btd"}> : () -> ()
    %cst_11 = arith.constant dense<0.000000e+00> : vector<1x8x32xf32>
    %34 = tpu.matmul %33, %18, %cst_11 {dimension_numbers = #tpu.dot_dimension_numbers<[2], [1], [1], [2], [0, 0, 0, 1, 1, 2], [0], [0]>} : vector<1x8x8xbf16>, vector<1x8x32xbf16>, vector<1x8x32xf32> -> vector<1x8x32xf32>
    "tpu.trace_stop"() : () -> ()
    %35 = vector.shape_cast %34 : vector<1x8x32xf32> to vector<8x32xf32>
    %36 = arith.truncf %35 : vector<8x32xf32> to vector<8x32xbf16>
    %c0_12 = arith.constant 0 : index
    %c0_13 = arith.constant 0 : index
    %c0_14 = arith.constant 0 : index
    %37 = vector.load %arg4[%c0_12, %c0_13, %c0_14] : memref<6x32x192xbf16, #tpu.memory_space<vmem>>, vector<1x32x192xbf16>
    %38 = vector.shape_cast %37 : vector<1x32x192xbf16> to vector<32x192xbf16>
    %cst_15 = arith.constant dense<0.000000e+00> : vector<8x192xf32>
    %39 = tpu.matmul %36, %38, %cst_15 {dimension_numbers = #tpu.dot_dimension_numbers<[1], [0], [0], [1], [0, 0, 1, 1], [], []>} : vector<8x32xbf16>, vector<32x192xbf16>, vector<8x192xf32> -> vector<8x192xf32>
    %40 = arith.addf %12, %39 : vector<8x192xf32>
    %41 = vector.extract_strided_slice %8 {offsets = [0, 0, 32], sizes = [1, 8, 32], strides = [1, 1, 1]} : vector<1x8x576xf32> to vector<1x8x32xf32>
    %42 = arith.truncf %41 : vector<1x8x32xf32> to vector<1x8x32xbf16>
    %43 = vector.extract_strided_slice %8 {offsets = [0, 0, 224], sizes = [1, 8, 32], strides = [1, 1, 1]} : vector<1x8x576xf32> to vector<1x8x32xf32>
    %44 = arith.truncf %43 : vector<1x8x32xf32> to vector<1x8x32xbf16>
    %45 = vector.extract_strided_slice %8 {offsets = [0, 0, 416], sizes = [1, 8, 32], strides = [1, 1, 1]} : vector<1x8x576xf32> to vector<1x8x32xf32>
    %46 = arith.truncf %45 : vector<1x8x32xf32> to vector<1x8x32xbf16>
    "tpu.trace_start"() <{level = 10 : i32, message = "btd,bsd->bts"}> : () -> ()
    %cst_16 = arith.constant dense<0.000000e+00> : vector<1x8x8xf32>
    %47 = tpu.matmul %42, %44, %cst_16 {dimension_numbers = #tpu.dot_dimension_numbers<[2], [2], [1], [1], [0, 0, 0, 1, 1, 1], [0], [0]>} : vector<1x8x32xbf16>, vector<1x8x32xbf16>, vector<1x8x8xf32> -> vector<1x8x8xf32>
    %cst_17 = arith.constant -1.000000e+30 : f32
    "tpu.trace_stop"() : () -> ()
    %48 = vector.shape_cast %11 : vector<8x8xi1> to vector<1x8x8xi1>
    %49 = vector.broadcast %cst_17 : f32 to vector<1x8x8xf32>
    %50 = arith.select %48, %47, %49 : vector<1x8x8xi1>, vector<1x8x8xf32>
    %cst_18 = arith.constant dense<0xFF800000> : vector<1x8xf32>
    %51 = vector.multi_reduction <maximumf>, %50, %cst_18 [2] : vector<1x8x8xf32> to vector<1x8xf32>
    %52 = vector.shape_cast %51 : vector<1x8xf32> to vector<1x8x1xf32>
    %53 = vector.broadcast %52 : vector<1x8x1xf32> to vector<1x8x8xf32>
    %54 = arith.subf %50, %53 : vector<1x8x8xf32>
    %55 = math.exp %54 : vector<1x8x8xf32>
    %cst_19 = arith.constant dense<0.000000e+00> : vector<1x8xf32>
    %56 = vector.multi_reduction <add>, %55, %cst_19 [2] : vector<1x8x8xf32> to vector<1x8xf32>
    %57 = vector.shape_cast %56 : vector<1x8xf32> to vector<1x8x1xf32>
    %58 = tpu.reciprocal %57 {approx = true} : vector<1x8x1xf32> -> vector<1x8x1xf32>
    %59 = vector.broadcast %58 : vector<1x8x1xf32> to vector<1x8x8xf32>
    %60 = arith.mulf %55, %59 : vector<1x8x8xf32>
    %61 = arith.truncf %60 : vector<1x8x8xf32> to vector<1x8x8xbf16>
    "tpu.trace_start"() <{level = 10 : i32, message = "bts,bsd->btd"}> : () -> ()
    %cst_20 = arith.constant dense<0.000000e+00> : vector<1x8x32xf32>
    %62 = tpu.matmul %61, %46, %cst_20 {dimension_numbers = #tpu.dot_dimension_numbers<[2], [1], [1], [2], [0, 0, 0, 1, 1, 2], [0], [0]>} : vector<1x8x8xbf16>, vector<1x8x32xbf16>, vector<1x8x32xf32> -> vector<1x8x32xf32>
    "tpu.trace_stop"() : () -> ()
    %63 = vector.shape_cast %62 : vector<1x8x32xf32> to vector<8x32xf32>
    %64 = arith.truncf %63 : vector<8x32xf32> to vector<8x32xbf16>
    %c1 = arith.constant 1 : index
    %c0_21 = arith.constant 0 : index
    %c0_22 = arith.constant 0 : index
    %65 = vector.load %arg4[%c1, %c0_21, %c0_22] : memref<6x32x192xbf16, #tpu.memory_space<vmem>>, vector<1x32x192xbf16>
    %66 = vector.shape_cast %65 : vector<1x32x192xbf16> to vector<32x192xbf16>
    %cst_23 = arith.constant dense<0.000000e+00> : vector<8x192xf32>
    %67 = tpu.matmul %64, %66, %cst_23 {dimension_numbers = #tpu.dot_dimension_numbers<[1], [0], [0], [1], [0, 0, 1, 1], [], []>} : vector<8x32xbf16>, vector<32x192xbf16>, vector<8x192xf32> -> vector<8x192xf32>
    %68 = arith.addf %40, %67 : vector<8x192xf32>
    %69 = vector.extract_strided_slice %8 {offsets = [0, 0, 64], sizes = [1, 8, 32], strides = [1, 1, 1]} : vector<1x8x576xf32> to vector<1x8x32xf32>
    %70 = arith.truncf %69 : vector<1x8x32xf32> to vector<1x8x32xbf16>
    %71 = vector.extract_strided_slice %8 {offsets = [0, 0, 256], sizes = [1, 8, 32], strides = [1, 1, 1]} : vector<1x8x576xf32> to vector<1x8x32xf32>
    %72 = arith.truncf %71 : vector<1x8x32xf32> to vector<1x8x32xbf16>
    %73 = vector.extract_strided_slice %8 {offsets = [0, 0, 448], sizes = [1, 8, 32], strides = [1, 1, 1]} : vector<1x8x576xf32> to vector<1x8x32xf32>
    %74 = arith.truncf %73 : vector<1x8x32xf32> to vector<1x8x32xbf16>
    "tpu.trace_start"() <{level = 10 : i32, message = "btd,bsd->bts"}> : () -> ()
    %cst_24 = arith.constant dense<0.000000e+00> : vector<1x8x8xf32>
    %75 = tpu.matmul %70, %72, %cst_24 {dimension_numbers = #tpu.dot_dimension_numbers<[2], [2], [1], [1], [0, 0, 0, 1, 1, 1], [0], [0]>} : vector<1x8x32xbf16>, vector<1x8x32xbf16>, vector<1x8x8xf32> -> vector<1x8x8xf32>
    %cst_25 = arith.constant -1.000000e+30 : f32
    "tpu.trace_stop"() : () -> ()
    %76 = vector.shape_cast %11 : vector<8x8xi1> to vector<1x8x8xi1>
    %77 = vector.broadcast %cst_25 : f32 to vector<1x8x8xf32>
    %78 = arith.select %76, %75, %77 : vector<1x8x8xi1>, vector<1x8x8xf32>
    %cst_26 = arith.constant dense<0xFF800000> : vector<1x8xf32>
    %79 = vector.multi_reduction <maximumf>, %78, %cst_26 [2] : vector<1x8x8xf32> to vector<1x8xf32>
    %80 = vector.shape_cast %79 : vector<1x8xf32> to vector<1x8x1xf32>
    %81 = vector.broadcast %80 : vector<1x8x1xf32> to vector<1x8x8xf32>
    %82 = arith.subf %78, %81 : vector<1x8x8xf32>
    %83 = math.exp %82 : vector<1x8x8xf32>
    %cst_27 = arith.constant dense<0.000000e+00> : vector<1x8xf32>
    %84 = vector.multi_reduction <add>, %83, %cst_27 [2] : vector<1x8x8xf32> to vector<1x8xf32>
    %85 = vector.shape_cast %84 : vector<1x8xf32> to vector<1x8x1xf32>
    %86 = tpu.reciprocal %85 {approx = true} : vector<1x8x1xf32> -> vector<1x8x1xf32>
    %87 = vector.broadcast %86 : vector<1x8x1xf32> to vector<1x8x8xf32>
    %88 = arith.mulf %83, %87 : vector<1x8x8xf32>
    %89 = arith.truncf %88 : vector<1x8x8xf32> to vector<1x8x8xbf16>
    "tpu.trace_start"() <{level = 10 : i32, message = "bts,bsd->btd"}> : () -> ()
    %cst_28 = arith.constant dense<0.000000e+00> : vector<1x8x32xf32>
    %90 = tpu.matmul %89, %74, %cst_28 {dimension_numbers = #tpu.dot_dimension_numbers<[2], [1], [1], [2], [0, 0, 0, 1, 1, 2], [0], [0]>} : vector<1x8x8xbf16>, vector<1x8x32xbf16>, vector<1x8x32xf32> -> vector<1x8x32xf32>
    "tpu.trace_stop"() : () -> ()
    %91 = vector.shape_cast %90 : vector<1x8x32xf32> to vector<8x32xf32>
    %92 = arith.truncf %91 : vector<8x32xf32> to vector<8x32xbf16>
    %c2 = arith.constant 2 : index
    %c0_29 = arith.constant 0 : index
    %c0_30 = arith.constant 0 : index
    %93 = vector.load %arg4[%c2, %c0_29, %c0_30] : memref<6x32x192xbf16, #tpu.memory_space<vmem>>, vector<1x32x192xbf16>
    %94 = vector.shape_cast %93 : vector<1x32x192xbf16> to vector<32x192xbf16>
    %cst_31 = arith.constant dense<0.000000e+00> : vector<8x192xf32>
    %95 = tpu.matmul %92, %94, %cst_31 {dimension_numbers = #tpu.dot_dimension_numbers<[1], [0], [0], [1], [0, 0, 1, 1], [], []>} : vector<8x32xbf16>, vector<32x192xbf16>, vector<8x192xf32> -> vector<8x192xf32>
    %96 = arith.addf %68, %95 : vector<8x192xf32>
    %97 = vector.extract_strided_slice %8 {offsets = [0, 0, 96], sizes = [1, 8, 32], strides = [1, 1, 1]} : vector<1x8x576xf32> to vector<1x8x32xf32>
    %98 = arith.truncf %97 : vector<1x8x32xf32> to vector<1x8x32xbf16>
    %99 = vector.extract_strided_slice %8 {offsets = [0, 0, 288], sizes = [1, 8, 32], strides = [1, 1, 1]} : vector<1x8x576xf32> to vector<1x8x32xf32>
    %100 = arith.truncf %99 : vector<1x8x32xf32> to vector<1x8x32xbf16>
    %101 = vector.extract_strided_slice %8 {offsets = [0, 0, 480], sizes = [1, 8, 32], strides = [1, 1, 1]} : vector<1x8x576xf32> to vector<1x8x32xf32>
    %102 = arith.truncf %101 : vector<1x8x32xf32> to vector<1x8x32xbf16>
    "tpu.trace_start"() <{level = 10 : i32, message = "btd,bsd->bts"}> : () -> ()
    %cst_32 = arith.constant dense<0.000000e+00> : vector<1x8x8xf32>
    %103 = tpu.matmul %98, %100, %cst_32 {dimension_numbers = #tpu.dot_dimension_numbers<[2], [2], [1], [1], [0, 0, 0, 1, 1, 1], [0], [0]>} : vector<1x8x32xbf16>, vector<1x8x32xbf16>, vector<1x8x8xf32> -> vector<1x8x8xf32>
    %cst_33 = arith.constant -1.000000e+30 : f32
    "tpu.trace_stop"() : () -> ()
    %104 = vector.shape_cast %11 : vector<8x8xi1> to vector<1x8x8xi1>
    %105 = vector.broadcast %cst_33 : f32 to vector<1x8x8xf32>
    %106 = arith.select %104, %103, %105 : vector<1x8x8xi1>, vector<1x8x8xf32>
    %cst_34 = arith.constant dense<0xFF800000> : vector<1x8xf32>
    %107 = vector.multi_reduction <maximumf>, %106, %cst_34 [2] : vector<1x8x8xf32> to vector<1x8xf32>
    %108 = vector.shape_cast %107 : vector<1x8xf32> to vector<1x8x1xf32>
    %109 = vector.broadcast %108 : vector<1x8x1xf32> to vector<1x8x8xf32>
    %110 = arith.subf %106, %109 : vector<1x8x8xf32>
    %111 = math.exp %110 : vector<1x8x8xf32>
    %cst_35 = arith.constant dense<0.000000e+00> : vector<1x8xf32>
    %112 = vector.multi_reduction <add>, %111, %cst_35 [2] : vector<1x8x8xf32> to vector<1x8xf32>
    %113 = vector.shape_cast %112 : vector<1x8xf32> to vector<1x8x1xf32>
    %114 = tpu.reciprocal %113 {approx = true} : vector<1x8x1xf32> -> vector<1x8x1xf32>
    %115 = vector.broadcast %114 : vector<1x8x1xf32> to vector<1x8x8xf32>
    %116 = arith.mulf %111, %115 : vector<1x8x8xf32>
    %117 = arith.truncf %116 : vector<1x8x8xf32> to vector<1x8x8xbf16>
    "tpu.trace_start"() <{level = 10 : i32, message = "bts,bsd->btd"}> : () -> ()
    %cst_36 = arith.constant dense<0.000000e+00> : vector<1x8x32xf32>
    %118 = tpu.matmul %117, %102, %cst_36 {dimension_numbers = #tpu.dot_dimension_numbers<[2], [1], [1], [2], [0, 0, 0, 1, 1, 2], [0], [0]>} : vector<1x8x8xbf16>, vector<1x8x32xbf16>, vector<1x8x32xf32> -> vector<1x8x32xf32>
    "tpu.trace_stop"() : () -> ()
    %119 = vector.shape_cast %118 : vector<1x8x32xf32> to vector<8x32xf32>
    %120 = arith.truncf %119 : vector<8x32xf32> to vector<8x32xbf16>
    %c3 = arith.constant 3 : index
    %c0_37 = arith.constant 0 : index
    %c0_38 = arith.constant 0 : index
    %121 = vector.load %arg4[%c3, %c0_37, %c0_38] : memref<6x32x192xbf16, #tpu.memory_space<vmem>>, vector<1x32x192xbf16>
    %122 = vector.shape_cast %121 : vector<1x32x192xbf16> to vector<32x192xbf16>
    %cst_39 = arith.constant dense<0.000000e+00> : vector<8x192xf32>
    %123 = tpu.matmul %120, %122, %cst_39 {dimension_numbers = #tpu.dot_dimension_numbers<[1], [0], [0], [1], [0, 0, 1, 1], [], []>} : vector<8x32xbf16>, vector<32x192xbf16>, vector<8x192xf32> -> vector<8x192xf32>
    %124 = arith.addf %96, %123 : vector<8x192xf32>
    %125 = vector.extract_strided_slice %8 {offsets = [0, 0, 128], sizes = [1, 8, 32], strides = [1, 1, 1]} : vector<1x8x576xf32> to vector<1x8x32xf32>
    %126 = arith.truncf %125 : vector<1x8x32xf32> to vector<1x8x32xbf16>
    %127 = vector.extract_strided_slice %8 {offsets = [0, 0, 320], sizes = [1, 8, 32], strides = [1, 1, 1]} : vector<1x8x576xf32> to vector<1x8x32xf32>
    %128 = arith.truncf %127 : vector<1x8x32xf32> to vector<1x8x32xbf16>
    %129 = vector.extract_strided_slice %8 {offsets = [0, 0, 512], sizes = [1, 8, 32], strides = [1, 1, 1]} : vector<1x8x576xf32> to vector<1x8x32xf32>
    %130 = arith.truncf %129 : vector<1x8x32xf32> to vector<1x8x32xbf16>
    "tpu.trace_start"() <{level = 10 : i32, message = "btd,bsd->bts"}> : () -> ()
    %cst_40 = arith.constant dense<0.000000e+00> : vector<1x8x8xf32>
    %131 = tpu.matmul %126, %128, %cst_40 {dimension_numbers = #tpu.dot_dimension_numbers<[2], [2], [1], [1], [0, 0, 0, 1, 1, 1], [0], [0]>} : vector<1x8x32xbf16>, vector<1x8x32xbf16>, vector<1x8x8xf32> -> vector<1x8x8xf32>
    %cst_41 = arith.constant -1.000000e+30 : f32
    "tpu.trace_stop"() : () -> ()
    %132 = vector.shape_cast %11 : vector<8x8xi1> to vector<1x8x8xi1>
    %133 = vector.broadcast %cst_41 : f32 to vector<1x8x8xf32>
    %134 = arith.select %132, %131, %133 : vector<1x8x8xi1>, vector<1x8x8xf32>
    %cst_42 = arith.constant dense<0xFF800000> : vector<1x8xf32>
    %135 = vector.multi_reduction <maximumf>, %134, %cst_42 [2] : vector<1x8x8xf32> to vector<1x8xf32>
    %136 = vector.shape_cast %135 : vector<1x8xf32> to vector<1x8x1xf32>
    %137 = vector.broadcast %136 : vector<1x8x1xf32> to vector<1x8x8xf32>
    %138 = arith.subf %134, %137 : vector<1x8x8xf32>
    %139 = math.exp %138 : vector<1x8x8xf32>
    %cst_43 = arith.constant dense<0.000000e+00> : vector<1x8xf32>
    %140 = vector.multi_reduction <add>, %139, %cst_43 [2] : vector<1x8x8xf32> to vector<1x8xf32>
    %141 = vector.shape_cast %140 : vector<1x8xf32> to vector<1x8x1xf32>
    %142 = tpu.reciprocal %141 {approx = true} : vector<1x8x1xf32> -> vector<1x8x1xf32>
    %143 = vector.broadcast %142 : vector<1x8x1xf32> to vector<1x8x8xf32>
    %144 = arith.mulf %139, %143 : vector<1x8x8xf32>
    %145 = arith.truncf %144 : vector<1x8x8xf32> to vector<1x8x8xbf16>
    "tpu.trace_start"() <{level = 10 : i32, message = "bts,bsd->btd"}> : () -> ()
    %cst_44 = arith.constant dense<0.000000e+00> : vector<1x8x32xf32>
    %146 = tpu.matmul %145, %130, %cst_44 {dimension_numbers = #tpu.dot_dimension_numbers<[2], [1], [1], [2], [0, 0, 0, 1, 1, 2], [0], [0]>} : vector<1x8x8xbf16>, vector<1x8x32xbf16>, vector<1x8x32xf32> -> vector<1x8x32xf32>
    "tpu.trace_stop"() : () -> ()
    %147 = vector.shape_cast %146 : vector<1x8x32xf32> to vector<8x32xf32>
    %148 = arith.truncf %147 : vector<8x32xf32> to vector<8x32xbf16>
    %c4 = arith.constant 4 : index
    %c0_45 = arith.constant 0 : index
    %c0_46 = arith.constant 0 : index
    %149 = vector.load %arg4[%c4, %c0_45, %c0_46] : memref<6x32x192xbf16, #tpu.memory_space<vmem>>, vector<1x32x192xbf16>
    %150 = vector.shape_cast %149 : vector<1x32x192xbf16> to vector<32x192xbf16>
    %cst_47 = arith.constant dense<0.000000e+00> : vector<8x192xf32>
    %151 = tpu.matmul %148, %150, %cst_47 {dimension_numbers = #tpu.dot_dimension_numbers<[1], [0], [0], [1], [0, 0, 1, 1], [], []>} : vector<8x32xbf16>, vector<32x192xbf16>, vector<8x192xf32> -> vector<8x192xf32>
    %152 = arith.addf %124, %151 : vector<8x192xf32>
    %153 = vector.extract_strided_slice %8 {offsets = [0, 0, 160], sizes = [1, 8, 32], strides = [1, 1, 1]} : vector<1x8x576xf32> to vector<1x8x32xf32>
    %154 = arith.truncf %153 : vector<1x8x32xf32> to vector<1x8x32xbf16>
    %155 = vector.extract_strided_slice %8 {offsets = [0, 0, 352], sizes = [1, 8, 32], strides = [1, 1, 1]} : vector<1x8x576xf32> to vector<1x8x32xf32>
    %156 = arith.truncf %155 : vector<1x8x32xf32> to vector<1x8x32xbf16>
    %157 = vector.extract_strided_slice %8 {offsets = [0, 0, 544], sizes = [1, 8, 32], strides = [1, 1, 1]} : vector<1x8x576xf32> to vector<1x8x32xf32>
    %158 = arith.truncf %157 : vector<1x8x32xf32> to vector<1x8x32xbf16>
    "tpu.trace_start"() <{level = 10 : i32, message = "btd,bsd->bts"}> : () -> ()
    %cst_48 = arith.constant dense<0.000000e+00> : vector<1x8x8xf32>
    %159 = tpu.matmul %154, %156, %cst_48 {dimension_numbers = #tpu.dot_dimension_numbers<[2], [2], [1], [1], [0, 0, 0, 1, 1, 1], [0], [0]>} : vector<1x8x32xbf16>, vector<1x8x32xbf16>, vector<1x8x8xf32> -> vector<1x8x8xf32>
    %cst_49 = arith.constant -1.000000e+30 : f32
    "tpu.trace_stop"() : () -> ()
    %160 = vector.shape_cast %11 : vector<8x8xi1> to vector<1x8x8xi1>
    %161 = vector.broadcast %cst_49 : f32 to vector<1x8x8xf32>
    %162 = arith.select %160, %159, %161 : vector<1x8x8xi1>, vector<1x8x8xf32>
    %cst_50 = arith.constant dense<0xFF800000> : vector<1x8xf32>
    %163 = vector.multi_reduction <maximumf>, %162, %cst_50 [2] : vector<1x8x8xf32> to vector<1x8xf32>
    %164 = vector.shape_cast %163 : vector<1x8xf32> to vector<1x8x1xf32>
    %165 = vector.broadcast %164 : vector<1x8x1xf32> to vector<1x8x8xf32>
    %166 = arith.subf %162, %165 : vector<1x8x8xf32>
    %167 = math.exp %166 : vector<1x8x8xf32>
    %cst_51 = arith.constant dense<0.000000e+00> : vector<1x8xf32>
    %168 = vector.multi_reduction <add>, %167, %cst_51 [2] : vector<1x8x8xf32> to vector<1x8xf32>
    %169 = vector.shape_cast %168 : vector<1x8xf32> to vector<1x8x1xf32>
    %170 = tpu.reciprocal %169 {approx = true} : vector<1x8x1xf32> -> vector<1x8x1xf32>
    %171 = vector.broadcast %170 : vector<1x8x1xf32> to vector<1x8x8xf32>
    %172 = arith.mulf %167, %171 : vector<1x8x8xf32>
    %173 = arith.truncf %172 : vector<1x8x8xf32> to vector<1x8x8xbf16>
    "tpu.trace_start"() <{level = 10 : i32, message = "bts,bsd->btd"}> : () -> ()
    %cst_52 = arith.constant dense<0.000000e+00> : vector<1x8x32xf32>
    %174 = tpu.matmul %173, %158, %cst_52 {dimension_numbers = #tpu.dot_dimension_numbers<[2], [1], [1], [2], [0, 0, 0, 1, 1, 2], [0], [0]>} : vector<1x8x8xbf16>, vector<1x8x32xbf16>, vector<1x8x32xf32> -> vector<1x8x32xf32>
    "tpu.trace_stop"() : () -> ()
    %175 = vector.shape_cast %174 : vector<1x8x32xf32> to vector<8x32xf32>
    %176 = arith.truncf %175 : vector<8x32xf32> to vector<8x32xbf16>
    %c5 = arith.constant 5 : index
    %c0_53 = arith.constant 0 : index
    %c0_54 = arith.constant 0 : index
    %177 = vector.load %arg4[%c5, %c0_53, %c0_54] : memref<6x32x192xbf16, #tpu.memory_space<vmem>>, vector<1x32x192xbf16>
    %178 = vector.shape_cast %177 : vector<1x32x192xbf16> to vector<32x192xbf16>
    %cst_55 = arith.constant dense<0.000000e+00> : vector<8x192xf32>
    %179 = tpu.matmul %176, %178, %cst_55 {dimension_numbers = #tpu.dot_dimension_numbers<[1], [0], [0], [1], [0, 0, 1, 1], [], []>} : vector<8x32xbf16>, vector<32x192xbf16>, vector<8x192xf32> -> vector<8x192xf32>
    %180 = arith.addf %152, %179 : vector<8x192xf32>
    %c0_56 = arith.constant 0 : index
    %c0_57 = arith.constant 0 : index
    %181 = vector.load %arg5[%c0_56, %c0_57] : memref<1x192xf32, #tpu.memory_space<vmem>>, vector<1x192xf32>
    %182 = vector.broadcast %181 : vector<1x192xf32> to vector<8x192xf32>
    %183 = arith.addf %180, %182 : vector<8x192xf32>
    %184 = vector.shape_cast %183 : vector<8x192xf32> to vector<1x8x192xf32>
    %c0_58 = arith.constant 0 : index
    %c0_59 = arith.constant 0 : index
    %c0_60 = arith.constant 0 : index
    %185 = vector.load %arg6[%c0_58, %c0_59, %c0_60] : memref<1x8x192xf32, #tpu.memory_space<vmem>>, vector<1x8x192xf32>
    tpu.vector_store %arg6[%c0_58, %c0_59, %c0_60], %184 {strides = array<i32>} : memref<1x8x192xf32, #tpu.memory_space<vmem>>, vector<1x8x192xf32>,
    return
  }
  func.func @transform_0(%arg0: i32) -> (i32, i32, i32) {
    %c0_i32 = arith.constant 0 : i32
    %c0_i32_0 = arith.constant 0 : i32
    %c0_i32_1 = arith.constant 0 : i32
    return %arg0, %c0_i32, %c0_i32_0 : i32, i32, i32
  }
  func.func @transform_1(%arg0: i32) -> (i32, i32) {
    %c0_i32 = arith.constant 0 : i32
    %c0_i32_0 = arith.constant 0 : i32
    %c0_i32_1 = arith.constant 0 : i32
    return %c0_i32, %c0_i32_0 : i32, i32
  }
  func.func @transform_2(%arg0: i32) -> (i32, i32) {
    %c0_i32 = arith.constant 0 : i32
    %c0_i32_0 = arith.constant 0 : i32
    %c0_i32_1 = arith.constant 0 : i32
    return %c0_i32, %c0_i32_0 : i32, i32
  }
  func.func @transform_3(%arg0: i32) -> (i32, i32, i32) {
    %c0_i32 = arith.constant 0 : i32
    %c0_i32_0 = arith.constant 0 : i32
    %c0_i32_1 = arith.constant 0 : i32
    %c0_i32_2 = arith.constant 0 : i32
    return %c0_i32, %c0_i32_0, %c0_i32_1 : i32, i32, i32
  }
  func.func @transform_4(%arg0: i32) -> (i32, i32) {
    %c0_i32 = arith.constant 0 : i32
    %c0_i32_0 = arith.constant 0 : i32
    %c0_i32_1 = arith.constant 0 : i32
    return %c0_i32, %c0_i32_0 : i32, i32
  }
  func.func @transform_5(%arg0: i32) -> (i32, i32, i32) {
    %c0_i32 = arith.constant 0 : i32
    %c0_i32_0 = arith.constant 0 : i32
    %c0_i32_1 = arith.constant 0 : i32
    return %arg0, %c0_i32, %c0_i32_0 : i32, i32, i32
  }
}

</mosaic_0001>

<bundles_post_ra>
// kernel: tpu_custom_call.1
= control target key start
LH: loop header
LB: loop body
LE: loop exit
PB: predicated region body
PF: predicated region fallthrough
CT: control target
= control target key end

     0   :  { %10 = vsyncpa [#allocation3], 0  ;;  %s2782_s0 = inlined_call_operand.hbm [shape: f32[2,8,192], index: 0, kind: input, shape index: {}]   ;;  %s2783_s1 = inlined_call_operand.hbm [shape: bf16[192,576], index: 1, kind: input, shape index: {}]   ;;  %s2784_s2 = inlined_call_operand.hbm [shape: f32[1,576], index: 2, kind: input, shape index: {}]   ;;  %s2785_s3 = inlined_call_operand.hbm [shape: bf16[6,32,192], index: 3, kind: input, shape index: {}]   ;;  %s2786_s4 = inlined_call_operand.vmem [shape: f32[1,192], index: 4, kind: input, shape index: {}]   ;;  %s2787_s5 = inlined_call_operand.hbm [shape: f32[2,8,192], index: 5, kind: output, shape index: {}]  }
   0x1   :  { %12 = vsyncpa [#allocation3 + $0x1], 0 }
   0x2   :  { %13 = vsyncpa [#allocation6], 0 }
   0x3   :  { %14 = vsyncpa [#allocation9], 0 }
   0x4   :  { %15 = vsyncpa [#allocation4], 0 }
   0x5   :  { %17 = vsyncpa [#allocation4 + $0x1], 0  ;;  %s2464_s18 = smov 0   ;;  %s2466_s19 = smov 0  }
   0x6   :  { %s2468_s20 = smov 0   ;;  %s2470_s21 = smov 0  }
   0x7 LB: > { %s175_s24 = sshll.u32 %s2783_s1, 4  ;;  %s2488_s25 = sadd.s32 4294967295, %s2422_s21   ;;  %s2422_s21 = sphi %s2470_s21, %s2800_s21   ;;  %s2418_s20 = sphi %s2468_s20, %s2799_s20   ;;  %s2414_s19 = sphi %s2466_s19, %s2798_s19   ;;  %s2410_s18 = sphi %s2464_s18, %s2797_s18   ;;  %s176_s24 = int_to_ptr.hbm [resolvable:$true] %s175_s24 }
   0x8   : > { %p1650_p0 = scmp.ge.s32.totalorder %s2422_s21, 1  ;;  %p44_p1 = scmp.eq.s32.totalorder %s2488_s25, 0 }
   0x9   : > { %p164_p2 = scmp.lt.s32.totalorder %s2422_s21, 3  ;;  %s2424_s27 = smov [#allocation5]  }
   0xa   : > { %s177_s28 = sshll.u32 %s2424_s27, 4  ;;  %s190_s6 = sshll.u32 %s2784_s2, 4  ;;  %s178_s28 = int_to_ptr.vmem [resolvable:$true] %s177_s28  ;;  %s191_s6 = int_to_ptr.hbm [resolvable:$true] %s190_s6 }
   0xb   : > { %p2493_p3 = pnand %p1650_p0, %p164_p2  ;;  %s201_s10 = sshll.u32 %s2785_s3, 4  ;;  %s202_s10 = int_to_ptr.hbm [resolvable:$true] %s201_s10 }
   0xc   : > { %s2425_s11 = smov [#allocation7]   ;;  %s2426_s13 = smov 320  }
   0xd   : > { %p2136_p4 = pneg %p2493_p3  ;;  %s192_s12 = sshll.u32 %s2425_s11, 4  ;;  %s193_s12 = int_to_ptr.vmem [resolvable:$true] %s192_s12 }
   0xe   : > { %s2427_s14 = smov 20   ;;  %s2428_s15 = smov [#allocation8]  }
   0xf   : > { %p2505_p6 = pnand %p2136_p4, %p44_p1  ;;  %s203_s16 = sshll.u32 %s2428_s15, 4  ;;  %s204_s16 = int_to_ptr.vmem [resolvable:$true] %s203_s16 }
  0x10   : > { %s2429_s17 = smov 128   ;;  %s2430_s22 = smov 8  }
  0x11   : > { %2139 = dma.hbm_to_vmem [thread:$0]  (!%p2505_p6), %s176_s24, 7680, %s178_s28, [#allocation6], %s2426_s13, %s2426_s13, %s2427_s14  }
  0x12   : > { %2142 = dma.hbm_to_vmem [thread:$0]  (!%p2505_p6), %s191_s6, 80, %s193_s12, [#allocation6]  }
  0x13   : > { %2145 = dma.hbm_to_vmem [thread:$0]  (!%p2505_p6), %s202_s10, 3072, %s204_s16, [#allocation9], %s2429_s17, %s2429_s17, %s2430_s22  }
  0x14   : > { %s1649_s23 = sadd.s32 4294967294, %s2422_s21   ;;  %s2520_s24 = sadd.s32 1, %s2422_s21  }
  0x15   : > { %s30_s27 = sadd.s32 1, %s2418_s20  ;;  %s27_s28 = ssub.s32 %s2422_s21, %s2520_s24 }
  0x16   : > { %p37_p7 = scmp.ne.s32.totalorder %s2418_s20, %s2414_s19  ;;  %p28_p8 = scmp.eq.s32.totalorder %s27_s28, 0 }
  0x17   : > { %p38_p9 = scmp.eq.s32.totalorder %s2422_s21, 0  ;;  %p43_p10 = scmp.ne.s32.totalorder %s2414_s19, %s2410_s18 }
  0x18   : > { %p151_p11 = scmp.eq.s32.totalorder %s2488_s25, 1  ;;  %p157_p0 = scmp.eq.s32.totalorder %s1649_s23, 1 }
  0x19   : > { %s2532_s29 = scalar_select %p28_p8, %s2418_s20, %s30_s27  }
  0x1a   : > { %p2536_p12 = por %p44_p1, %p43_p10  ;;  %p2540_p13 = por %p151_p11, %p37_p7 }
  0x1b   : > { %p39_p2 = por %p38_p9, %p37_p7  ;;  %s220_s7 = sand.u32 1, %s2418_s20  }
  0x1c   : > { %p2545_p4 = por %p157_p0, %p43_p10  ;;  %p2157_p6 = scmp.lt.s32.totalorder %s2422_s21, 2 }
  0x1d   : > { %s1655_s9 = sshll.u32 %s220_s7, 4  ;;  %s2034_s10 = sshll.u32 %s2422_s21, 4 }
  0x1e   : > { %s229_s13 = scalar_lea.hbm %s2782_s0, %s2034_s10  ;;  %s224_s15 = scalar_lea.vmem [#allocation2], %s1655_s9 }
  0x1f   : > { %s231_s14 = sshll.u32 %s229_s13, 4  ;;  %s233_s16 = sshll.u32 %s224_s15, 4  ;;  %s232_s14 = int_to_ptr.hbm [resolvable:$true] %s231_s14  ;;  %s234_s16 = int_to_ptr.vmem [resolvable:$true] %s233_s16 }
  0x20   : > { %p2554_p8 = pnand %p2157_p6, %p39_p2  ;;  %s221_s22 = scalar_lea.sflag [#allocation3], %s220_s7 }
  0x21   : > { %s2318_s23 = sshra.s32 %s232_s14, 4  ;;  %s2325_s9 = scalar_lea.hbm %s2782_s0, 32  ;;  %s2319_s23 = int_to_ptr.hbm [resolvable:$true] %s2318_s23 }
  0x22   : > { %s2320_s27 = scalar_lea.hbm %s2319_s23, 16  ;;  %p2322_p9 = pneg %p2554_p8 }
  0x23   : > { %p2321_p7 = scmp.ne.s32.totalorder %s2319_s23, %s2320_s27  ;;  %p2326_p0 = scmp.lt.s32.totalorder %s2319_s23, %s2782_s0 }
  0x24   : > { %p2327_p2 = scmp.lt.s32.totalorder %s2325_s9, %s2320_s27 }
  0x25   : > { %p2323_p10 = pnand %p2322_p9, %p2321_p7 }
  0x26   : > { %p2328_p6 = por %p2327_p2, %p2326_p0 }
  0x27   : > { %p2324_p11 = pneg %p2323_p10 }
  0x29   : > { %p2329_p5 = pnand %p2328_p6, %p2324_p11 }
  0x2b   : > { %2332 = shalt.err (!%p2329_p5)
}
  0x2c   : > { %2149 = dma.hbm_to_vmem [thread:$0]  (!%p2554_p8), %s232_s14, 256, %s234_s16, %s221_s22  }
  0x2d   : > { %242 = sbr.rel (%p2493_p3) target bundleno = 1593 (0x639), region = 40  ;;  %s2571_s7 = sand.u32 (!%p2493_p3), 1, %s2414_s19  }
  0x2e   : > { %s1659_s13 = sshll.u32 (!%p2493_p3), %s2571_s7, 4  ;;  %s245_s15 = scalar_lea.sflag (!%p2493_p3), [#allocation3], %s2571_s7 }
  0x2f   : > { %s2577_s23 = scalar_lea.vmem (!%p2493_p3), [#allocation2], %s1659_s13 }
  0x32   : > { %2393 = dma.done.wait (%p2536_p12), %s245_s15, 256  }
  0x33   : > { %2395 = vsyncadd (%p2536_p12), %s245_s15, 4294967040 }
  0x34   : > { %2397 = dma.done.wait (%p44_p1), [#allocation6], 7760  }
  0x35   : > { %2399 = vsyncadd (%p44_p1), [#allocation6], 4294959536 }
  0x36   : > { %2401 = dma.done.wait (%p44_p1), [#allocation9], 3072  }
  0x37   : > { %2403 = vsyncadd (%p44_p1), [#allocation9], 4294964224  ;;  %v2070_v0 = vld [vmem:[#allocation5 + $0x11c] sm:$0xf]  ;;  %v1808_v1 = vld [vmem:[#allocation5 + $0x12c] sm:$0xf0] }
  0x38   : > { %v2065_v2 = vld [vmem:[#allocation5 + $0xf4] sm:$0xf]  ;;  %v1811_v3 = vor.u32 %v2070_v0, %v1808_v1  ;;  %v1788_v4 = vld [vmem:[#allocation5 + $0x104] sm:$0xf0]  ;;  %v1806_v5 = vld [vmem:[#allocation5 + $0x118] sm:$0xf] }
  0x39   : > { %v2072_v6 = vld [vmem:[#allocation5 + $0x128] sm:$0xf0]  ;;  %v1786_v8 = vld [vmem:[#allocation5 + $0xf0] sm:$0xf]  ;;  %v1791_v9 = vor.u32 %v2065_v2, %v1788_v4  ;;  %v2067_v10 = vld [vmem:[#allocation5 + $0x100] sm:$0xf0] }
  0x3a   : > { %v1807_v7 = vor.u32 %v2072_v6, %v1806_v5  ;;  %722 = vmatpush.bf16.msra.mxu2 %v1811_v3  ;;  %v2090_v11 = vld [vmem:[#allocation5 + $0x1bc] sm:$0xf]  ;;  %v1888_v12 = vld [vmem:[#allocation5 + $0x1cc] sm:$0xf0]  ;;  %v2060_v13 = vld [vmem:[#allocation5 + $0xcc] sm:$0xf]  ;;  %v1787_v15 = vor.u32 %v2067_v10, %v1786_v8 }
  0x3b   : > { %v1768_v14 = vld [vmem:[#allocation5 + $0xdc] sm:$0xf0]  ;;  %v1891_v16 = vor.u32 %v2090_v11, %v1888_v12  ;;  %v1766_v17 = vld [vmem:[#allocation5 + $0xc8] sm:$0xf]  ;;  %v2062_v18 = vld [vmem:[#allocation5 + $0xd8] sm:$0xf0] }
  0x3c   : > { %696 = vmatpush.bf16.msra.mxu0 %v1807_v7  ;;  %v2085_v19 = vld [vmem:[#allocation5 + $0x194] sm:$0xf]  ;;  %v1868_v20 = vld [vmem:[#allocation5 + $0x1a4] sm:$0xf0]  ;;  %v1886_v22 = vld [vmem:[#allocation5 + $0x1b8] sm:$0xf]  ;;  %v1771_v23 = vor.u32 %v2060_v13, %v1768_v14  ;;  %v1767_v27 = vor.u32 %v2062_v18, %v1766_v17 }
  0x3d   : > { %739 = vmatpush.bf16.msra.mxu3 %v1891_v16  ;;  %v1871_v21 = vor.u32 %v2085_v19, %v1868_v20  ;;  %v2055_v24 = vld [vmem:[#allocation5 + $0xa4] sm:$0xf]  ;;  %v1748_v25 = vld [vmem:[#allocation5 + $0xb4] sm:$0xf0]  ;;  %v2092_v26 = vld [vmem:[#allocation5 + $0x1c8] sm:$0xf0] }
  0x3e   : > { %723 = vmatpush.bf16.msra.mxu2 %v1791_v9  ;;  %v1887_v28 = vor.u32 %v2092_v26, %v1886_v22  ;;  %v1746_v29 = vld [vmem:[#allocation5 + $0xa0] sm:$0xf]  ;;  %v2080_v30 = vld [vmem:[#allocation5 + $0x16c] sm:$0xf]  ;;  %v2057_v32 = vld [vmem:[#allocation5 + $0xb0] sm:$0xf0]  ;;  %v1751_v37 = vor.u32 %v2055_v24, %v1748_v25 }
  0x3f   : > { %v1848_v31 = vld [vmem:[#allocation5 + $0x17c] sm:$0xf0]  ;;  %v1866_v33 = vld [vmem:[#allocation5 + $0x190] sm:$0xf]  ;;  %v2087_v34 = vld [vmem:[#allocation5 + $0x1a0] sm:$0xf0]  ;;  %v1747_v42 = vor.u32 %v2057_v32, %v1746_v29 }
  0x40   : > { %697 = vmatpush.bf16.msra.mxu0 %v1787_v15  ;;  %713 = vmatpush.bf16.msra.mxu1 %v1887_v28  ;;  %v1851_v35 = vor.u32 %v2080_v30, %v1848_v31  ;;  %v1867_v36 = vor.u32 %v2087_v34, %v1866_v33  ;;  %v2050_v38 = vld [vmem:[#allocation5 + $0x7c] sm:$0xf]  ;;  %v2075_v39 = vld [vmem:[#allocation5 + $0x144] sm:$0xf]  ;;  %v1828_v40 = vld [vmem:[#allocation5 + $0x154] sm:$0xf0] }
  0x41   : > { %740 = vmatpush.bf16.msra.mxu3 %v1871_v21  ;;  %v1728_v41 = vld [vmem:[#allocation5 + $0x8c] sm:$0xf0]  ;;  %v1846_v43 = vld [vmem:[#allocation5 + $0x168] sm:$0xf]  ;;  %v2082_v44 = vld [vmem:[#allocation5 + $0x178] sm:$0xf0]  ;;  %v1831_v47 = vor.u32 %v2075_v39, %v1828_v40 }
  0x42   : > { %724 = vmatpush.bf16.msra.mxu2 %v1771_v23  ;;  %v1726_v45 = vld [vmem:[#allocation5 + $0x78] sm:$0xf]  ;;  %v2052_v46 = vld [vmem:[#allocation5 + $0x88] sm:$0xf0]  ;;  %v1847_v48 = vor.u32 %v2082_v44, %v1846_v43  ;;  %v1731_v50 = vor.u32 %v2050_v38, %v1728_v41  ;;  %v2045_v51 = vld [vmem:[#allocation5 + $0x54] sm:$0xf] }
  0x43   : > { %v293_v49 = vld [vmem:[%s2577_s23 + $0x8] sm:$0xff]  ;;  %v1826_v52 = vld [vmem:[#allocation5 + $0x140] sm:$0xf]  ;;  %v2077_v53 = vld [vmem:[#allocation5 + $0x150] sm:$0xf0]  ;;  %v1727_v55 = vor.u32 %v2052_v46, %v1726_v45  ;;  %vm692_vm0 = vcmask 523264  }
  0x44   : > { %698 = vmatpush.bf16.msra.mxu0 %v1767_v27  ;;  %714 = vmatpush.bf16.msra.mxu1 %v1867_v36  ;;  %v1708_v54 = vld [vmem:[#allocation5 + $0x64] sm:$0xf0]  ;;  %v1814_v56 = vld [vmem:[#allocation5 + $0x120] sm:$0xf]  ;;  %v2073_v57 = vld [vmem:[#allocation5 + $0x130] sm:$0xf0]  ;;  %v2592_v58 = vpack.c.bf16 %v293_v49, %v293_v49  ;;  %v1827_v62 = vor.u32 %v2077_v53, %v1826_v52 }
  0x45   : > { %741 = vmatpush.bf16.msra.mxu3 %v1851_v35  ;;  %v1706_v59 = vld [vmem:[#allocation5 + $0x50] sm:$0xf]  ;;  %v2047_v60 = vld [vmem:[#allocation5 + $0x60] sm:$0xf0]  ;;  %v2040_v61 = vld [vmem:[#allocation5 + $0x2c] sm:$0xf]  ;;  %v1711_v63 = vor.u32 %v2045_v51, %v1708_v54  ;;  %v1815_v1 = vor.u32 %v2073_v57, %v1814_v56 }
  0x46   : > { %725 = vmatpush.bf16.msra.mxu2 %v1751_v37  ;;  %v1688_v0 = vld [vmem:[#allocation5 + $0x3c] sm:$0xf0]  ;;  %v2093_v3 = vld [vmem:[#allocation5 + $0x1d0] sm:$0xf0]  ;;  %v1707_v4 = vor.u32 %v2047_v60, %v1706_v59  ;;  %v1794_v5 = vld [vmem:[#allocation5 + $0xf8] sm:$0xf] }
  0x47   : > { %v1894_v2 = vld [vmem:[#allocation5 + $0x1c0] sm:$0xf]  ;;  %v2068_v6 = vld [vmem:[#allocation5 + $0x108] sm:$0xf0]  ;;  %v1874_v8 = vld [vmem:[#allocation5 + $0x198] sm:$0xf]  ;;  %v1691_v13 = vor.u32 %v2040_v61, %v1688_v0 }
  0x48   : > { %699 = vmatpush.bf16.msra.mxu0 %v1747_v42  ;;  %715 = vmatpush.bf16.msra.mxu1 %v1847_v48  ;;  %v1895_v7 = vor.u32 %v2093_v3, %v1894_v2  ;;  %v1686_v9 = vld [vmem:[#allocation5 + $0x28] sm:$0xf]  ;;  %v2042_v10 = vld [vmem:[#allocation5 + $0x38] sm:$0xf0]  ;;  %v2088_v11 = vld [vmem:[#allocation5 + $0x1a8] sm:$0xf0]  ;;  %v1795_v15 = vor.u32 %v2068_v6, %v1794_v5 }
  0x49   : > { %742 = vmatpush.bf16.msra.mxu3 %v1831_v47  ;;  %v1875_v12 = vor.u32 %v2088_v11, %v1874_v8  ;;  %v2035_v14 = vld [vmem:[#allocation5 + $0x4] sm:$0xf]  ;;  %v1854_v16 = vld [vmem:[#allocation5 + $0x170] sm:$0xf]  ;;  %v1668_v18 = vld [vmem:[#allocation5 + $0x14] sm:$0xf0]  ;;  %v1687_v19 = vor.u32 %v2042_v10, %v1686_v9 }
  0x4a   : > { %726 = vmatpush.bf16.msra.mxu2 %v1731_v50  ;;  %v2083_v17 = vld [vmem:[#allocation5 + $0x180] sm:$0xf0]  ;;  %v1774_v20 = vld [vmem:[#allocation5 + $0xd0] sm:$0xf]  ;;  %v1666_v22 = vld [vmem:[#allocation5] sm:$0xf]  ;;  %v1671_v25 = vor.u32 %v2035_v14, %v1668_v18 }
  0x4b   : > { %v2063_v21 = vld [vmem:[#allocation5 + $0xe0] sm:$0xf0]  ;;  %v2037_v23 = vld [vmem:[#allocation5 + $0x10] sm:$0xf0]  ;;  %v1855_v24 = vor.u32 %v2083_v17, %v1854_v16  ;;  %v1834_v28 = vld [vmem:[#allocation5 + $0x148] sm:$0xf] }
  0x4c   : > { %700 = vmatpush.bf16.msra.mxu0 %v1727_v55  ;;  %1905 = vmatmul.msk.bf16.vlgmr.msra.gmra.mxu3 %vm692_vm0, %v2592_v58  ;;  %v292_v26 = vld [vmem:[%s2577_s23] sm:$0xff]  ;;  %v1775_v27 = vor.u32 %v2063_v21, %v1774_v20  ;;  %v2078_v29 = vld [vmem:[#allocation5 + $0x158] sm:$0xf0]  ;;  %v1667_v30 = vor.u32 %v2037_v23, %v1666_v22  ;;  %v1754_v31 = vld [vmem:[#allocation5 + $0xa8] sm:$0xf]  ;;  %s2431_s26 = smov 32  }
  0x4d   : > { %716 = vmatpush.bf16.msra.mxu1 %v1827_v62  ;;  %765 = vmatpush.bf16.msrb.mxu3 %v1895_v7  ;;  %v2058_v32 = vld [vmem:[#allocation5 + $0xb8] sm:$0xf0]  ;;  %v2599_v33 = vpack.c.bf16 %v292_v26, %v292_v26  ;;  %v1835_v34 = vor.u32 %v2078_v29, %v1834_v28  ;;  %v1734_v36 = vld [vmem:[#allocation5 + $0x80] sm:$0xf]  ;;  %v2053_v37 = vld [vmem:[#allocation5 + $0x90] sm:$0xf0] }
  0x4e   : > { %727 = vmatpush.bf16.msra.mxu2 %v1711_v63  ;;  %v1755_v35 = vor.u32 %v2058_v32, %v1754_v31  ;;  %v1735_v38 = vor.u32 %v2053_v37, %v1734_v36  ;;  %v1714_v39 = vld [vmem:[#allocation5 + $0x58] sm:$0xf]  ;;  %v2048_v40 = vld [vmem:[#allocation5 + $0x68] sm:$0xf0]  ;;  %v1694_v42 = vld [vmem:[#allocation5 + $0x30] sm:$0xf] }
  0x4f   : > { %v1715_v41 = vor.u32 %v2048_v40, %v1714_v39  ;;  %v2043_v43 = vld [vmem:[#allocation5 + $0x40] sm:$0xf0]  ;;  %v1674_v45 = vld [vmem:[#allocation5 + $0x8] sm:$0xf]  ;;  %v2038_v46 = vld [vmem:[#allocation5 + $0x18] sm:$0xf0] }
  0x50   : > { %701 = vmatpush.bf16.msra.mxu0 %v1707_v4  ;;  %1904 = vmatmul.msk.bf16.vlgmr.msra.gmra.mxu1 %vm692_vm0, %v2592_v58  ;;  %v1695_v44 = vor.u32 %v2043_v43, %v1694_v42  ;;  %v1675_v47 = vor.u32 %v2038_v46, %v1674_v45  ;;  %v2606_v51 = vld [vmem:[#allocation7] sm:$0x1f]  ;;  %s2432_s30 = smov 96   ;;  %v2069_v16 = vld [vmem:[#allocation5 + $0x110] sm:$0xf0]  ;;  %s2433_s14 = smov 64  }
  0x51   : > { %748 = vmatpush.bf16.msrb.mxu1 %v1815_v1  ;;  %766 = vmatpush.bf16.msrb.mxu3 %v1875_v12  ;;  %v370_v52 = vperm.slane %v2606_v51, 0  ;;  %v371_v55 = vperm.slane %v2606_v51, 1  ;;  %v372_v6 = vperm.slane %v2606_v51, 2  ;;  %v1822_v12 = vld [vmem:[#allocation5 + $0x128] sm:$0xf]  ;;  %vm839_vm1 = vcmask 261120  }
  0x52   : > { %728 = vmatpush.bf16.msra.mxu2 %v1691_v13  ;;  %v2074_v13 = vld [vmem:[#allocation5 + $0x138] sm:$0xf0]  ;;  %v1802_v14 = vld [vmem:[#allocation5 + $0x100] sm:$0xf]  ;;  %v1902_v18 = vld [vmem:[#allocation5 + $0x1c8] sm:$0xf] }
  0x53   : > { %v1803_v17 = vor.u32 %v2069_v16, %v1802_v14  ;;  %v1782_v21 = vld [vmem:[#allocation5 + $0xd8] sm:$0xf]  ;;  %v2064_v22 = vld [vmem:[#allocation5 + $0xe8] sm:$0xf0]  ;;  %v2094_v23 = vld [vmem:[#allocation5 + $0x1d8] sm:$0xf0] }
  0x54   : > { %702 = vmatpush.bf16.msra.mxu0 %v1687_v19  ;;  %v2089_v26 = vld [vmem:[#allocation5 + $0x1b0] sm:$0xf0]  ;;  %v1762_v28 = vld [vmem:[#allocation5 + $0xb0] sm:$0xf]  ;;  %v2059_v31 = vld [vmem:[#allocation5 + $0xc0] sm:$0xf0] }
  0x55   : > { %749 = vmatpush.bf16.msrb.mxu1 %v1795_v15  ;;  %767 = vmatpush.bf16.msrb.mxu3 %v1855_v24  ;;  %v1823_v15 = vor.u32 %v2074_v13, %v1822_v12  ;;  %v1903_v24 = vor.u32 %v2094_v23, %v1902_v18  ;;  %v1862_v32 = vld [vmem:[#allocation5 + $0x178] sm:$0xf]  ;;  %v1742_v36 = vld [vmem:[#allocation5 + $0x88] sm:$0xf]  ;;  %v2054_v39 = vld [vmem:[#allocation5 + $0x98] sm:$0xf0] }
  0x56   : > { %729 = vmatpush.bf16.msra.mxu2 %v1671_v25  ;;  %v1882_v25 = vld [vmem:[#allocation5 + $0x1a0] sm:$0xf]  ;;  %v1842_v40 = vld [vmem:[#allocation5 + $0x150] sm:$0xf]  ;;  %v1743_v42 = vor.u32 %v2054_v39, %v1742_v36  ;;  %v2049_v45 = vld [vmem:[#allocation5 + $0x70] sm:$0xf0] }
  0x57   : > { %v1883_v29 = vor.u32 %v2089_v26, %v1882_v25  ;;  %v2061_v12 = vld [vmem:[#allocation5 + $0xd4] sm:$0xf]  ;;  %v1776_v13 = vld [vmem:[#allocation5 + $0xe4] sm:$0xf0]  ;;  %v2056_v16 = vld [vmem:[#allocation5 + $0xac] sm:$0xf] }
  0x58   : > { %703 = vmatpush.bf16.msra.mxu0 %v1667_v30  ;;  %v2051_v26 = vld [vmem:[#allocation5 + $0x84] sm:$0xf]  ;;  %vm860_vm3 = vcmask 64512   ;;  %vm876_vm4 = vcmask 1043456   ;;  %s2119_s22 = sshll.u32 %s2488_s25, 4  ;;  %s290_s9 = scalar_lea.vmem [#allocation10], %s1659_s13 }
  0x59   : > { %750 = vmatpush.bf16.msrb.mxu1 %v1775_v27  ;;  %730 = vmatmul.bf16.vlgmr.msra.gmra.mxu2 %v2599_v33  ;;  %v1783_v27 = vor.u32 %v2064_v22, %v1782_v21  ;;  %v374_v21 = vperm.slane %v2606_v51, 4  ;;  %s1545_s10 = scalar_lea.hbm %s2787_s5, %s2119_s22  ;;  %s1547_s11 = sshll.u32 %s290_s9, 4  ;;  %s1548_s11 = int_to_ptr.vmem [resolvable:$true] %s1547_s11 }
  0x5a   : > { %768 = vmatpush.bf16.msrb.mxu3 %v1835_v34  ;;  %v2084_v34 = vld [vmem:[#allocation5 + $0x188] sm:$0xf0]  ;;  %s1549_s12 = sshll.u32 %s1545_s10, 4  ;;  %s1534_s25 = scalar_lea.sflag [#allocation4], %s2571_s7  ;;  %s1550_s12 = int_to_ptr.hbm [resolvable:$true] %s1549_s12 }
  0x5b   : > { %704 = vmatmul.bf16.vlgmr.msra.gmra.mxu0 %v2599_v33  ;;  %v1863_v37 = vor.u32 %v2084_v34, %v1862_v32  ;;  %v2046_v32 = vld [vmem:[#allocation5 + $0x5c] sm:$0xf]  ;;  %v1716_v34 = vld [vmem:[#allocation5 + $0x6c] sm:$0xf0]  ;;  %s2362_s15 = sshra.s32 %s1550_s12, 4  ;;  %s2363_s15 = int_to_ptr.hbm [resolvable:$true] %s2362_s15 }
  0x5c   : > { %v1719_v36 = vor.u32 %v2046_v32, %v1716_v34  ;;  %s2364_s23 = scalar_lea.hbm %s2363_s15, 16  ;;  %p2369_p12 = scmp.lt.s32.totalorder %s2363_s15, %s2787_s5 }
  0x5d   : > { %751 = vmatpush.bf16.msrb.mxu1 %v1755_v35  ;;  %1906 = vmatmul.msk.bf16.vlgmr.msrb.gmra.mxu3 %vm692_vm0, %v2592_v58  ;;  %v1763_v35 = vor.u32 %v2059_v31, %v1762_v28  ;;  %p2365_p1 = scmp.ne.s32.totalorder %s2363_s15, %s2364_s23 }
  0x5e   : > { %800 = vmatpush.bf16.msra.mxu3 %v1823_v15  ;;  %v1779_v15 = vor.u32 %v2061_v12, %v1776_v13 }
  0x5f   : > { %p2366_p3 = pnand %p2365_p1, %p2540_p13 }
  0x61   : > { %752 = vmatpush.bf16.msrb.mxu1 %v1735_v38  ;;  %p2367_p5 = pneg %p2366_p3 }
  0x62   : > { %801 = vmatpush.bf16.msra.mxu3 %v1803_v17  ;;  %v1756_v17 = vld [vmem:[#allocation5 + $0xbc] sm:$0xf0] }
  0x65   : > { %753 = vmatpush.bf16.msrb.mxu1 %v1715_v41  ;;  %v2079_v41 = vld [vmem:[#allocation5 + $0x160] sm:$0xf0] }
  0x66   : > { %802 = vmatpush.bf16.msra.mxu3 %v1783_v27  ;;  %v1843_v43 = vor.u32 %v2079_v41, %v1842_v40  ;;  %v1736_v27 = vld [vmem:[#allocation5 + $0x94] sm:$0xf0]  ;;  %v2041_v40 = vld [vmem:[#allocation5 + $0x34] sm:$0xf]  ;;  %v1696_v41 = vld [vmem:[#allocation5 + $0x44] sm:$0xf0] }
  0x67   : > { %v1739_v28 = vor.u32 %v2051_v26, %v1736_v27 }
  0x69   : > { %754 = vmatpush.bf16.msrb.mxu1 %v1695_v44  ;;  %v1722_v44 = vld [vmem:[#allocation5 + $0x60] sm:$0xf] }
  0x6a   : > { %803 = vmatpush.bf16.msra.mxu3 %v1763_v35  ;;  %v1723_v46 = vor.u32 %v2049_v45, %v1722_v44  ;;  %v2081_v35 = vld [vmem:[#allocation5 + $0x174] sm:$0xf]  ;;  %v1836_v44 = vld [vmem:[#allocation5 + $0x15c] sm:$0xf0]  ;;  %v2036_v45 = vld [vmem:[#allocation5 + $0xc] sm:$0xf] }
  0x6d   : > { %755 = vmatpush.bf16.msrb.mxu1 %v1675_v47  ;;  %v1702_v47 = vld [vmem:[#allocation5 + $0x38] sm:$0xf] }
  0x6e   : > { %804 = vmatpush.bf16.msra.mxu3 %v1743_v42  ;;  %v2076_v42 = vld [vmem:[#allocation5 + $0x14c] sm:$0xf] }
  0x70   : > { %756 = vmatmul.bf16.vlgmr.msrb.gmra.mxu1 %v2599_v33 }
  0x71   : > { %817 = vmatpush.bf16.msra.mxu1 %v1903_v24 }
  0x72   : > { %805 = vmatpush.bf16.msra.mxu3 %v1723_v46  ;;  %v1676_v46 = vld [vmem:[#allocation5 + $0x1c] sm:$0xf0] }
  0x75   : > { %818 = vmatpush.bf16.msra.mxu1 %v1883_v29  ;;  %v2086_v29 = vld [vmem:[#allocation5 + $0x19c] sm:$0xf] }
  0x79   : > { %819 = vmatpush.bf16.msra.mxu1 %v1863_v37  ;;  %v1856_v37 = vld [vmem:[#allocation5 + $0x184] sm:$0xf0] }
  0x7a   : > { %v1859_v39 = vor.u32 %v2081_v35, %v1856_v37 }
  0x7d   : > { %820 = vmatpush.bf16.msra.mxu1 %v1843_v43  ;;  %v1699_v43 = vor.u32 %v2041_v40, %v1696_v41  ;;  %v2101_v40 = vld [vmem:[#allocation8 + $0x34] sm:$0xf]  ;;  %v1925_v41 = vld [vmem:[#allocation8 + $0x38] sm:$0xf0] }
  0x80   : > { %1908 = vmatmul.msk.bf16.vlgmr.msra.gmra.mxu1 %vm692_vm0, %v2592_v58 }
  0xcd   : > { %v718_v48 = vpop.f32.mrf.mxu1 }
  0xcf   : > { %v744_v49 = vpop.f32.mrf.mxu3 }
  0xd5   : > { %v720_v50 = vpop.f32.mrf.mxu1 }
  0xd6   : > { %v1682_v50 = vld [vmem:[#allocation5 + $0x10] sm:$0xf] }
  0xd7   : > { %v746_v54 = vpop.f32.mrf.mxu3 }
  0xd8   : > { %v705_v53 = vpop.f32.mrf.mxu0 }
  0xd9   : > { %v706_v56 = vadd.f32 %v705_v53, %v370_v52  ;;  %v2039_v52 = vld [vmem:[#allocation5 + $0x20] sm:$0xf0] }
  0xda   : > { %v1683_v53 = vor.u32 %v2039_v52, %v1682_v50 }
  0xdb   : > { %v719_v61 = vadd.f32 %v718_v48, %v706_v56  ;;  %v2044_v48 = vld [vmem:[#allocation5 + $0x48] sm:$0xf0] }
  0xdc   : > { %v731_v57 = vpop.f32.mrf.mxu2 }
  0xdd   : > { %v732_v59 = vadd.f32 %v731_v57, %v371_v55  ;;  %v2612_v1 = vpack.c.bf16 %v719_v61, %v719_v61  ;;  %v1923_v57 = vld [vmem:[#allocation8 + $0x30] sm:$0xf] }
  0xdf   : > { %v745_v60 = vadd.f32 %v744_v49, %v732_v59  ;;  %v899_v5 = vunpack.c.l.b16 %v2612_v1  ;;  %v1703_v49 = vor.u32 %v2044_v48, %v1702_v47  ;;  %v2102_v59 = vld [vmem:[#allocation8 + $0x34] sm:$0xf0]  ;;  %v1839_v47 = vor.u32 %v2076_v42, %v1836_v44  ;;  %v1917_v44 = vld [vmem:[#allocation8 + $0x28] sm:$0xf0] }
  0xe0   : > { %v707_v62 = vpop.f32.mrf.mxu0  ;;  %v770_v63 = vpop.f32.mrf.mxu3  ;;  %v1924_v61 = vor.u32 %v2102_v59, %v1923_v57  ;;  %v1679_v48 = vor.u32 %v2036_v45, %v1676_v46  ;;  %v1928_v42 = vor.u32 %v2101_v40, %v1925_v41 }
  0xe1   : > { %v2610_v0 = vpack.c.bf16 %v745_v60, %v745_v60  ;;  %v900_v9 = vpack.c.b16 %v899_v5, %v899_v5  ;;  %806 = vmatpush.bf16.msra.mxu3 %v1703_v49  ;;  %v1915_v60 = vld [vmem:[#allocation8 + $0x20] sm:$0xf]  ;;  %v2100_v62 = vld [vmem:[#allocation8 + $0x24] sm:$0xf0]  ;;  %v1816_v5 = vld [vmem:[#allocation5 + $0x134] sm:$0xf0]  ;;  %v826_v49 = vlaneseq }
  0xe3   : > { %v835_v2 = vunpack.c.l.b16 %v2610_v0  ;;  %v827_v50 = vshrl.u32 %v826_v49, 7  ;;  %v829_v52 = vand.u32 127, %v826_v49 }
  0xe4   : > { %v733_v3 = vpop.f32.mrf.mxu2 }
  0xe5   : > { %v2615_v4 = vpack.c.b16 %v835_v2, %v835_v2  ;;  %807 = vmatpush.bf16.msra.mxu3 %v1683_v53  ;;  %v2071_v3 = vld [vmem:[#allocation5 + $0x124] sm:$0xf]  ;;  %vm2646_vm2 = vcmp.le.s32.totalorder %v829_v52, %v827_v50  ;;  %v2097_v53 = vld [vmem:[#allocation8 + $0x14] sm:$0xf] }
  0xe7   : > { %903 = vrot.lane.b32.xlu0 %v2615_v4, %s2431_s26 }
  0xe8   : > { %v772_v7 = vpop.f32.mrf.mxu3  ;;  %808 = vmatmul.bf16.vlgmr.msra.gmra.mxu3 %v2599_v33 }
  0xe9   : > { %996 = vmatpush.bf16.msrb.mxu3 %v1924_v61  ;;  %v1819_v7 = vor.u32 %v2071_v3, %v1816_v5 }
  0xeb   : > { %774 = vmatpush.bf16.msrb.mxu0 %v1819_v7 }
  0xed   : > { %v757_v8 = vpop.f32.mrf.mxu1 }
  0xee   : > { %v758_v10 = vadd.f32 %v757_v8, %v372_v6  ;;  %v2066_v6 = vld [vmem:[#allocation5 + $0xfc] sm:$0xf]  ;;  %v1796_v8 = vld [vmem:[#allocation5 + $0x10c] sm:$0xf0] }
  0xef   : > { %901 = vrot.lane.b32.xlu0 %v900_v9, %s2432_s30 }
  0xf0   : > { %v771_v11 = vadd.f32 %v770_v63, %v758_v10  ;;  %v1916_v63 = vor.u32 %v2100_v62, %v1915_v60  ;;  %v1799_v10 = vor.u32 %v2066_v6, %v1796_v8 }
  0xf2   : > { %v2622_v20 = vpack.c.bf16 %v771_v11, %v771_v11  ;;  %997 = vmatpush.bf16.msrb.mxu3 %v1916_v63  ;;  %v1896_v11 = vld [vmem:[#allocation5 + $0x1d4] sm:$0xf0]  ;;  %775 = vmatpush.bf16.msrb.mxu0 %v1799_v10 }
  0xf4   : > { %v1181_v30 = vunpack.c.l.b16 %v2622_v20  ;;  %v1072_v2 = vsel %vm839_vm1, %v2622_v20, 0 }
  0xf5   : > { %v759_v19 = vpop.f32.mrf.mxu1 }
  0xf6   : > { %v2626_v38 = vpack.c.b16 %v1181_v30, %v1181_v30  ;;  %1081 = vmatpush.bf16.xpose.msra.mxu3 %v1072_v2  ;;  %776 = vmatpush.bf16.msrb.mxu0 %v1779_v15  ;;  %v1759_v19 = vor.u32 %v2056_v16, %v1756_v17  ;;  %v1876_v30 = vld [vmem:[#allocation5 + $0x1ac] sm:$0xf0] }
  0xf7   : > { %1066 = vrot.lane.b32.xlu0 %v900_v9, %s2433_s14  ;;  %v1879_v31 = vor.u32 %v2086_v29, %v1876_v30 }
  0xfa   : > { %777 = vmatpush.bf16.msrb.mxu0 %v1759_v19 }
  0xfd   : > { %v822_v18 = vpop.f32.mrf.mxu1 }
  0xfe   : > { %778 = vmatpush.bf16.msrb.mxu0 %v1739_v28 }
  0xff   : > { %1183 = vrot.lane.b32.xlu0 %v2626_v38, %s2432_s30 }
 0x102   : > { %779 = vmatpush.bf16.msrb.mxu0 %v1719_v36 }
 0x105   : > { %v824_v20 = vpop.f32.mrf.mxu1 }
 0x106   : > { %780 = vmatpush.bf16.msrb.mxu0 %v1699_v43  ;;  %v2099_v43 = vld [vmem:[#allocation8 + $0x24] sm:$0xf] }
 0x107   : > { %1178 = vrot.lane.b32.xlu0 %v900_v9, %s2431_s26  ;;  %v2091_v9 = vld [vmem:[#allocation5 + $0x1c4] sm:$0xf]  ;;  %v1920_v45 = vor.u32 %v2099_v43, %v1917_v44 }
 0x108   : > { %v1899_v14 = vor.u32 %v2091_v9, %v1896_v11 }
 0x10a   : > { %791 = vmatpush.bf16.msrb.mxu2 %v1899_v14  ;;  %781 = vmatpush.bf16.msrb.mxu0 %v1679_v48 }
 0x10d   : > { %782 = vmatmul.bf16.vlgmr.msrb.gmra.mxu0 %v2599_v33 }
 0x10e   : > { %792 = vmatpush.bf16.msrb.mxu2 %v1879_v31 }
 0x10f   : > { %1406 = vrot.lane.b32.xlu0 %v2615_v4, %s2432_s30 }
 0x112   : > { %793 = vmatpush.bf16.msrb.mxu2 %v1859_v39 }
 0x116   : > { %794 = vmatpush.bf16.msrb.mxu2 %v1839_v47 }
 0x119   : > { %1907 = vmatmul.msk.bf16.vlgmr.msrb.gmra.mxu2 %vm692_vm0, %v2592_v58  ;;  %v373_v58 = vperm.slane %v2606_v51, 3 }
 0x159   : > { %v904_v54 = vpop.permute.xlu0 %903 }
 0x15a   : > { %v909_v55 = vsel %vm839_vm1, %v904_v54, 0 }
 0x15b   : > { %918 = vmatpush.bf16.xpose.msrb.mxu1 %v909_v55 }
 0x161   : > { %v902_v56 = vpop.permute.xlu0 %901 }
 0x162   : > { %1911 = vmatmul.msk.bf16.vlgmr.msrb.gmra.mxu1 %vm839_vm1, %v902_v56 }
 0x16b   : > { %v809_v22 = vpop.f32.mrf.mxu3 }
 0x16c   : > { %v810_v23 = vadd.f32 %v809_v22, %v374_v21 }
 0x16e   : > { %v2641_v24 = vadd.f32 %v822_v18, %v810_v23 }
 0x173   : > { %v811_v25 = vpop.f32.mrf.mxu3 }
 0x18a   : > { %v783_v33 = vpop.f32.mrf.mxu0 }
 0x18b   : > { %v784_v59 = vadd.f32 %v783_v33, %v373_v58 }
 0x192   : > { %v785_v5 = vpop.f32.mrf.mxu0 }
 0x19c   : > { %v796_v60 = vpop.f32.mrf.mxu2 }
 0x19d   : > { %v797_v61 = vadd.f32 %v796_v60, %v784_v59 }
 0x19f   : > { %v833_v63 = vpack.c.bf16 %v797_v61, %v797_v61 }
 0x1a1   : > { %v878_v3 = vsel %vm876_vm4, %v833_v63, 0  ;;  %v938_v10 = vunpack.c.l.b16 %v833_v63 }
 0x1a2   : > { %887 = vmatpush.bf16.msra.mxu0 %v878_v3 }
 0x1a3   : > { %v2661_v11 = vpack.c.b16 %v938_v10, %v938_v10 }
 0x1a6   : > { %1009 = vmatpush.bf16.msrb.mxu0 %v1928_v42 }
 0x1aa   : > { %1010 = vmatpush.bf16.msrb.mxu0 %v1920_v45 }
 0x1df   : > { %v920_v54 = vpop.f32.mrf.mxu1 }
 0x1e0   : > { %v924_v55 = vsel %vm2646_vm2, %v920_v54, -1e+30 }
 0x1e1   : > { %v925_v56 = vsel %vm860_vm3, %v924_v55, -inf }
 0x1e2   : > { %926 = vmax.xlane.f32.xlu1 %v925_v56 }
 0x1e7   : > { %v922_v57 = vpop.f32.mrf.mxu1 }
 0x1fb   : > { %837 = vrot.lane.b32.xlu1 %v2615_v4, %s2433_s14  ;;  %v798_v4 = vpop.f32.mrf.mxu2 }
 0x1fc   : > { %v2702_v4 = vpack.c.bf16 %v2641_v24, %v2641_v24  ;;  %v2095_v24 = vld [vmem:[#allocation8 + $0x4] sm:$0xf] }
 0x203   : > { %1408 = vrot.lane.b32.xlu1 %v2626_v38, %s2431_s26 }
 0x255   : > { %v927_v62 = vpop.xlane.xlu1 %926 }
 0x256   : > { %v928_v2 = vsub.f32 %v924_v55, %v927_v62 }
 0x258   : > { %v929_v6 = vmul.f32 1.442695, %v928_v2 }
 0x25a   : > { %2204 = vpow2.f32 %v929_v6 }
 0x260   : > { %v2205_v7 = vpop.eup %2204 }
 0x261   : > { %v931_v8 = vsel %vm860_vm3, %v2205_v7, 0.0 }
 0x262   : > { %932 = vadd.xlane.f32.xlu2 %v931_v8 }
 0x26d   : > { %v838_v51 = vpop.permute.xlu1 %837 }
 0x26e   : > { %v844_v9 = vsel %vm839_vm1, %v838_v51, 0  ;;  %v1941_v51 = vld [vmem:[#allocation8 + $0x10] sm:$0xf] }
 0x26f   : > { %853 = vmatpush.bf16.xpose.msra.mxu2 %v844_v9  ;;  %v2098_v9 = vld [vmem:[#allocation8 + $0x14] sm:$0xf0] }
 0x270   : > { %v1942_v10 = vor.u32 %v2098_v9, %v1941_v51 }
 0x272   : > { %1045 = vmatpush.bf16.msra.mxu1 %v1942_v10 }
 0x275   : > { %v1409_v35 = vpop.permute.xlu1 %1408 }
 0x276   : > { %1909 = vmatmul.msk.bf16.vlgmr.msra.gmra.mxu2 %vm839_vm1, %v2612_v1  ;;  %v1414_v37 = vsel %vm839_vm1, %v1409_v35, 0 }
 0x27a   : > { %940 = vrot.lane.b32.xlu2 %v2661_v11, %s2432_s30 }
 0x282   : > { %1296 = vrot.lane.b32.xlu2 %v2626_v38, %s2433_s14  ;;  %v1067_v38 = vpop.permute.xlu0 %1066 }
 0x28a   : > { %v1184_v23 = vpop.permute.xlu0 %1183 }
 0x28b   : > { %v1189_v26 = vsel %vm839_vm1, %v1184_v23, 0 }
 0x292   : > { %v1179_v36 = vpop.permute.xlu0 %1178 }
 0x29a   : > { %v1407_v39 = vpop.permute.xlu0 %1406 }
 0x2d5   : > { %v933_v12 = vpop.xlane.xlu2 %932 }
 0x2d6   : > { %2206 = vrcp.f32 %v933_v12  ;;  %v1943_v12 = vld [vmem:[#allocation8 + $0x18] sm:$0xf0] }
 0x2dc   : > { %v2207_v13 = vpop.eup %2206 }
 0x2dd   : > { %v935_v14 = vmul.f32 %v2207_v13, %v2205_v7  ;;  %v941_v15 = vpop.permute.xlu2 %940  ;;  %v1443_v7 = vunpack.c.l.b16 %v2702_v4  ;;  %v1946_v13 = vor.u32 %v2097_v53, %v1943_v12 }
 0x2de   : > { %v946_v16 = vsel %vm876_vm4, %v941_v15, 0  ;;  %v2096_v15 = vld [vmem:[#allocation8 + $0x4] sm:$0xf0] }
 0x2df   : > { %v936_v17 = vpack.c.bf16 %v935_v14, %v935_v14  ;;  %955 = vmatpush.bf16.msrb.mxu2 %v946_v16  ;;  %v1444_v8 = vpack.c.b16 %v1443_v7, %v1443_v7  ;;  %v1933_v14 = vld [vmem:[#allocation8] sm:$0xf]  ;;  %v1963_v7 = vld [vmem:[#allocation8 + $0x58] sm:$0xf0] }
 0x2e0   : > { %v1934_v16 = vor.u32 %v2096_v15, %v1933_v14  ;;  %v1953_v15 = vld [vmem:[#allocation8 + $0x40] sm:$0xf] }
 0x2e2   : > { %1912 = vmatmul.msk.bf16.vlgmr.msrb.gmra.mxu2 %vm860_vm3, %v936_v17  ;;  %v1935_v17 = vld [vmem:[#allocation8 + $0x8] sm:$0xf0]  ;;  %1046 = vmatpush.bf16.msra.mxu1 %v1934_v16  ;;  %v2103_v16 = vld [vmem:[#allocation8 + $0x44] sm:$0xf] }
 0x2e3   : > { %1058 = vmatpush.bf16.msra.mxu2 %v1946_v13 }
 0x2e5   : > { %v1297_v25 = vpop.permute.xlu2 %1296 }
 0x2e6   : > { %v1302_v31 = vsel %vm839_vm1, %v1297_v25, 0 }
 0x2f9   : > { %v855_v18 = vpop.f32.mrf.mxu2 }
 0x2fa   : > { %v859_v1 = vsel %vm2646_vm2, %v855_v18, -1e+30  ;;  %v1938_v18 = vor.u32 %v2095_v24, %v1935_v17  ;;  %v2104_v24 = vld [vmem:[#allocation8 + $0x44] sm:$0xf0] }
 0x2fb   : > { %v861_v19 = vsel %vm860_vm3, %v859_v1, -inf  ;;  %v1954_v17 = vor.u32 %v2104_v24, %v1953_v15 }
 0x2fc   : > { %862 = vmax.xlane.f32.xlu2 %v861_v19  ;;  %1059 = vmatpush.bf16.msra.mxu2 %v1938_v18  ;;  %v1955_v18 = vld [vmem:[#allocation8 + $0x48] sm:$0xf0] }
 0x301   : > { %v857_v20 = vpop.f32.mrf.mxu2 }
 0x365   : > { %v957_v21 = vpop.f32.mrf.mxu2 }
 0x366   : > { %v961_v22 = vpack.c.bf16 %v957_v21, %v957_v21 }
 0x368   : > { %1929 = vmatmul.msk.bf16.vlgmr.msrb.gmra.mxu3 %vm839_vm1, %v961_v22 }
 0x369   : > { %1198 = vmatpush.bf16.xpose.msrb.mxu3 %v1189_v26 }
 0x36d   : > { %v959_v27 = vpop.f32.mrf.mxu2 }
 0x36f   : > { %v863_v28 = vpop.xlane.xlu2 %862 }
 0x370   : > { %v864_v29 = vsub.f32 %v859_v1, %v863_v28 }
 0x372   : > { %v865_v30 = vmul.f32 1.442695, %v864_v29 }
 0x374   : > { %2208 = vpow2.f32 %v865_v30 }
 0x378   : > { %1949 = vmatmul.msk.bf16.vlgmr.msra.gmra.mxu3 %vm839_vm1, %v1067_v38 }
 0x379   : > { %1311 = vmatpush.bf16.xpose.msra.mxu3 %v1302_v31 }
 0x37a   : > { %v2209_v32 = vpop.eup %2208 }
 0x37b   : > { %v867_v34 = vsel %vm860_vm3, %v2209_v32, 0.0 }
 0x37c   : > { %868 = vadd.xlane.f32.xlu2 %v867_v34 }
 0x388   : > { %1969 = vmatmul.msk.bf16.vlgmr.msrb.gmra.mxu3 %vm839_vm1, %v1179_v36 }
 0x389   : > { %1423 = vmatpush.bf16.xpose.msrb.mxu3 %v1414_v37 }
 0x398   : > { %1989 = vmatmul.msk.bf16.vlgmr.msra.gmra.mxu3 %vm839_vm1, %v2610_v0 }
 0x3a8   : > { %2009 = vmatmul.msk.bf16.vlgmr.msrb.gmra.mxu3 %vm839_vm1, %v1407_v39 }
 0x3eb   : > { %v2684_v46 = vpop.f32.mrf.mxu3 }
 0x3ef   : > { %v869_v47 = vpop.xlane.xlu2 %868 }
 0x3f0   : > { %2210 = vrcp.f32 %v869_v47 }
 0x3f3   : > { %v1001_v48 = vpop.f32.mrf.mxu3 }
 0x3f6   : > { %v2211_v49 = vpop.eup %2210 }
 0x3f7   : > { %v871_v50 = vmul.f32 %v2211_v49, %v2209_v32 }
 0x3f9   : > { %v872_v52 = vpack.c.bf16 %v871_v50, %v871_v50 }
 0x3fb   : > { %1910 = vmatmul.msk.bf16.vlgmr.msra.gmra.mxu0 %vm860_vm3, %v872_v52  ;;  %v1083_v0 = vpop.f32.mrf.mxu3 }
 0x3fc   : > { %v1087_v54 = vsel %vm2646_vm2, %v1083_v0, -1e+30 }
 0x3fd   : > { %v1088_v55 = vsel %vm860_vm3, %v1087_v54, -inf }
 0x3fe   : > { %1089 = vmax.xlane.f32.xlu1 %v1088_v55 }
 0x403   : > { %v1085_v56 = vpop.f32.mrf.mxu3 }
 0x40b   : > { %1930 = vmatmul.msk.bf16.vlgmr.msrb.gmra.mxu0 %vm839_vm1, %v961_v22  ;;  %v1200_v57 = vpop.f32.mrf.mxu3 }
 0x40c   : > { %v1204_v58 = vsel %vm2646_vm2, %v1200_v57, -1e+30 }
 0x40d   : > { %v1205_v33 = vsel %vm860_vm3, %v1204_v58, -inf }
 0x40e   : > { %1206 = vmax.xlane.f32.xlu0 %v1205_v33  ;;  %v1334_v33 = vsel %vm876_vm4, %v2702_v4, 0 }
 0x413   : > { %v1202_v59 = vpop.f32.mrf.mxu3 }
 0x41b   : > { %v1313_v60 = vpop.f32.mrf.mxu3 }
 0x41c   : > { %v1317_v61 = vsel %vm2646_vm2, %v1313_v60, -1e+30 }
 0x41d   : > { %v1318_v62 = vsel %vm860_vm3, %v1317_v61, -inf }
 0x41e   : > { %1319 = vmax.xlane.f32.xlu1 %v1318_v62 }
 0x423   : > { %v1315_v63 = vpop.f32.mrf.mxu3 }
 0x42b   : > { %v1425_v2 = vpop.f32.mrf.mxu3 }
 0x42c   : > { %v1429_v3 = vsel %vm2646_vm2, %v1425_v2, -1e+30  ;;  %v1961_v2 = vld [vmem:[#allocation8 + $0x50] sm:$0xf] }
 0x42d   : > { %v1430_v5 = vsel %vm860_vm3, %v1429_v3, -inf }
 0x42e   : > { %1431 = vmax.xlane.f32.xlu2 %v1430_v5  ;;  %v2105_v5 = vld [vmem:[#allocation8 + $0x54] sm:$0xf] }
 0x433   : > { %v1427_v6 = vpop.f32.mrf.mxu3 }
 0x437   : > { %1100 = vrot.lane.b32.xlu1 %v2661_v11, %s2433_s14 }
 0x43f   : > { %1445 = vrot.lane.b32.xlu1 %v1444_v8, %s2432_s30  ;;  %v1966_v8 = vor.u32 %v2105_v5, %v1963_v7  ;;  %s2368_s30 = scalar_lea.hbm %s2787_s5, 32 }
 0x440   : > { %p2370_p8 = scmp.lt.s32.totalorder %s2368_s30, %s2364_s23 }
 0x441   : > { %1169 = vmatpush.bf16.msrb.mxu2 %v1966_v8 }
 0x442   : > { %p2371_p7 = por %p2370_p8, %p2369_p12 }
 0x444   : > { %p2372_p9 = pnand %p2371_p7, %p2367_p5 }
 0x471   : > { %v1090_v1 = vpop.xlane.xlu1 %1089 }
 0x472   : > { %v1091_v19 = vsub.f32 %v1087_v54, %v1090_v1  ;;  %v1958_v1 = vor.u32 %v2103_v16, %v1955_v18 }
 0x474   : > { %v1092_v20 = vmul.f32 1.442695, %v1091_v19  ;;  %1170 = vmatpush.bf16.msrb.mxu2 %v1958_v1  ;;  %v1981_v19 = vld [vmem:[#allocation8 + $0x70] sm:$0xf] }
 0x476   : > { %2212 = vpow2.f32 %v1092_v20  ;;  %v2110_v20 = vld [vmem:[#allocation8 + $0x74] sm:$0xf0] }
 0x478   : > { %v889_v38 = vpop.f32.mrf.mxu0 }
 0x479   : > { %v893_v21 = vpack.c.bf16 %v889_v38, %v889_v38  ;;  %v2109_v38 = vld [vmem:[#allocation8 + $0x74] sm:$0xf] }
 0x47b   : > { %1947 = vmatmul.msk.bf16.vlgmr.msra.gmra.mxu1 %vm839_vm1, %v893_v21  ;;  %1948 = vmatmul.msk.bf16.vlgmr.msra.gmra.mxu2 %vm839_vm1, %v893_v21  ;;  %v1982_v21 = vor.u32 %v2110_v20, %v1981_v19  ;;  %v1523_v20 = vld [vmem:[%s2786_s4] sm:$0x3] }
 0x47c   : > { %v2213_v22 = vpop.eup %2212 }
 0x47d   : > { %v1094_v23 = vsel %vm860_vm3, %v2213_v22, 0.0 }
 0x47e   : > { %1095 = vadd.xlane.f32.xlu0 %v1094_v23 }
 0x480   : > { %v891_v25 = vpop.f32.mrf.mxu0 }
 0x481   : > { %v1207_v26 = vpop.xlane.xlu0 %1206  ;;  %v1973_v25 = vld [vmem:[#allocation8 + $0x60] sm:$0xf] }
 0x482   : > { %v1208_v27 = vsub.f32 %v1204_v58, %v1207_v26  ;;  %v2108_v26 = vld [vmem:[#allocation8 + $0x64] sm:$0xf0] }
 0x484   : > { %v1209_v28 = vmul.f32 1.442695, %v1208_v27  ;;  %v2107_v27 = vld [vmem:[#allocation8 + $0x64] sm:$0xf] }
 0x486   : > { %2214 = vpow2.f32 %v1209_v28  ;;  %v1974_v28 = vor.u32 %v2108_v26, %v1973_v25  ;;  %v1525_v25 = vperm.slane %v1523_v20, 0 }
 0x488   : > { %v2711_v29 = vpop.f32.mrf.mxu0 }
 0x48c   : > { %v2215_v30 = vpop.eup %2214 }
 0x48d   : > { %v1211_v31 = vsel %vm860_vm3, %v2215_v30, 0.0 }
 0x48e   : > { %1212 = vadd.xlane.f32.xlu2 %v1211_v31 }
 0x490   : > { %v1014_v32 = vpop.f32.mrf.mxu0 }
 0x491   : > { %v1320_v34 = vpop.xlane.xlu1 %1319  ;;  %v2001_v32 = vld [vmem:[#allocation8 + $0x90] sm:$0xf] }
 0x492   : > { %v1321_v35 = vsub.f32 %v1317_v61, %v1320_v34  ;;  %1217 = vrot.lane.b32.xlu0 %v2661_v11, %s2431_s26  ;;  %v2114_v34 = vld [vmem:[#allocation8 + $0x94] sm:$0xf0] }
 0x494   : > { %v1322_v36 = vmul.f32 1.442695, %v1321_v35  ;;  %v2113_v35 = vld [vmem:[#allocation8 + $0x94] sm:$0xf] }
 0x496   : > { %2216 = vpow2.f32 %v1322_v36  ;;  %v2003_v36 = vld [vmem:[#allocation8 + $0x98] sm:$0xf0] }
 0x49c   : > { %v2217_v37 = vpop.eup %2216 }
 0x49d   : > { %v1324_v39 = vsel %vm860_vm3, %v2217_v37, 0.0 }
 0x49e   : > { %1325 = vadd.xlane.f32.xlu2 %v1324_v39  ;;  %v2002_v39 = vor.u32 %v2114_v34, %v2001_v32 }
 0x4a1   : > { %v1432_v40 = vpop.xlane.xlu2 %1431 }
 0x4a2   : > { %v1433_v41 = vsub.f32 %v1429_v3, %v1432_v40  ;;  %v2106_v3 = vld [vmem:[#allocation8 + $0x54] sm:$0xf0]  ;;  %v2006_v40 = vor.u32 %v2113_v35, %v2003_v36 }
 0x4a3   : > { %v1962_v6 = vor.u32 %v2106_v3, %v1961_v2 }
 0x4a4   : > { %v1434_v42 = vmul.f32 1.442695, %v1433_v41  ;;  %v1993_v41 = vld [vmem:[#allocation8 + $0x80] sm:$0xf] }
 0x4a5   : > { %1156 = vmatpush.bf16.msrb.mxu1 %v1962_v6 }
 0x4a6   : > { %2218 = vpow2.f32 %v1434_v42 }
 0x4a9   : > { %v1101_v43 = vpop.permute.xlu1 %1100  ;;  %1157 = vmatpush.bf16.msrb.mxu1 %v1954_v17 }
 0x4aa   : > { %v1106_v44 = vsel %vm876_vm4, %v1101_v43, 0  ;;  %v2112_v43 = vld [vmem:[#allocation8 + $0x84] sm:$0xf0] }
 0x4ab   : > { %1115 = vmatpush.bf16.msra.mxu0 %v1106_v44  ;;  %v2111_v44 = vld [vmem:[#allocation8 + $0x84] sm:$0xf] }
 0x4ac   : > { %v2219_v45 = vpop.eup %2218 }
 0x4ad   : > { %v1436_v47 = vsel %vm860_vm3, %v2219_v45, 0.0  ;;  %1273 = vmatpush.bf16.msra.mxu1 %v1982_v21 }
 0x4ae   : > { %1437 = vadd.xlane.f32.xlu2 %v1436_v47  ;;  %v1994_v47 = vor.u32 %v2112_v43, %v1993_v41 }
 0x4b1   : > { %v1446_v60 = vpop.permute.xlu1 %1445  ;;  %1274 = vmatpush.bf16.msra.mxu1 %v1974_v28 }
 0x4b2   : > { %v1451_v63 = vsel %vm876_vm4, %v1446_v60, 0  ;;  %v2116_v60 = vld [vmem:[#allocation8 + $0xa4] sm:$0xf0] }
 0x4f1   : > { %v1096_v48 = vpop.xlane.xlu0 %1095 }
 0x4f2   : > { %2220 = vrcp.f32 %v1096_v48 }
 0x4f8   : > { %v2221_v11 = vpop.eup %2220  ;;  %v2719_v49 = vpop.f32.mrf.mxu1 }
 0x4f9   : > { %v1098_v50 = vmul.f32 %v2221_v11, %v2213_v22  ;;  %v1983_v22 = vld [vmem:[#allocation8 + $0x78] sm:$0xf0]  ;;  %v1049_v1 = vadd.f32 %v2719_v49, %v2684_v46 }
 0x4fa   : > { %v1986_v23 = vor.u32 %v2109_v38, %v1983_v22 }
 0x4fb   : > { %v1099_v52 = vpack.c.bf16 %v1098_v50, %v1098_v50  ;;  %v2021_v50 = vld [vmem:[#allocation8 + $0xb0] sm:$0xf] }
 0x4fc   : > { %1286 = vmatpush.bf16.msra.mxu2 %v1986_v23 }
 0x4fd   : > { %1950 = vmatmul.msk.bf16.vlgmr.msra.gmra.mxu0 %vm860_vm3, %v1099_v52  ;;  %v2118_v52 = vld [vmem:[#allocation8 + $0xb4] sm:$0xf0] }
 0x4fe   : > { %v2722_v0 = vpop.f32.mrf.mxu2 }
 0x4ff   : > { %v1062_v22 = vadd.f32 %v2722_v0, %v2711_v29 }
 0x500   : > { %v1050_v54 = vpop.f32.mrf.mxu1 }
 0x501   : > { %v1213_v55 = vpop.xlane.xlu2 %1212  ;;  %v2117_v54 = vld [vmem:[#allocation8 + $0xb4] sm:$0xf] }
 0x502   : > { %2222 = vrcp.f32 %v1213_v55  ;;  %v2023_v55 = vld [vmem:[#allocation8 + $0xb8] sm:$0xf0] }
 0x504   : > { %v1218_v56 = vpop.permute.xlu0 %1217 }
 0x505   : > { %v1223_v57 = vsel %vm876_vm4, %v1218_v56, 0 }
 0x506   : > { %v1063_v58 = vpop.f32.mrf.mxu2  ;;  %1232 = vmatpush.bf16.msrb.mxu0 %v1223_v57  ;;  %v2022_v57 = vor.u32 %v2118_v52, %v2021_v50 }
 0x507   : > { %v2026_v58 = vor.u32 %v2117_v54, %v2023_v55 }
 0x508   : > { %v2223_v59 = vpop.eup %2222 }
 0x509   : > { %v1215_v61 = vmul.f32 %v2223_v59, %v2215_v30  ;;  %v1975_v30 = vld [vmem:[#allocation8 + $0x68] sm:$0xf0] }
 0x50a   : > { %1343 = vmatpush.bf16.msra.mxu0 %v1334_v33  ;;  %v1978_v31 = vor.u32 %v2107_v27, %v1975_v30  ;;  %v2013_v33 = vld [vmem:[#allocation8 + $0xa0] sm:$0xf] }
 0x50b   : > { %v1216_v62 = vpack.c.bf16 %v1215_v61, %v1215_v61  ;;  %v2115_v61 = vld [vmem:[#allocation8 + $0xa4] sm:$0xf] }
 0x50c   : > { %1287 = vmatpush.bf16.msra.mxu2 %v1978_v31  ;;  %v1526_v31 = vperm.slane %v1523_v20, 1 }
 0x50d   : > { %1970 = vmatmul.msk.bf16.vlgmr.msrb.gmra.mxu0 %vm860_vm3, %v1216_v62  ;;  %v2015_v62 = vld [vmem:[#allocation8 + $0xa8] sm:$0xf0] }
 0x50e   : > { %1460 = vmatpush.bf16.msrb.mxu0 %v1451_v63  ;;  %v2014_v63 = vor.u32 %v2116_v60, %v2013_v33  ;;  %v2018_v2 = vor.u32 %v2115_v61, %v2015_v62 }
 0x511   : > { %v1326_v51 = vpop.xlane.xlu2 %1325 }
 0x512   : > { %2224 = vrcp.f32 %v1326_v51 }
 0x518   : > { %v2225_v4 = vpop.eup %2224 }
 0x519   : > { %v1328_v9 = vmul.f32 %v2225_v4, %v2217_v37 }
 0x51b   : > { %v1329_v53 = vpack.c.bf16 %v1328_v9, %v1328_v9 }
 0x51d   : > { %1990 = vmatmul.msk.bf16.vlgmr.msra.gmra.mxu0 %vm860_vm3, %v1329_v53 }
 0x521   : > { %v1438_v10 = vpop.xlane.xlu2 %1437 }
 0x522   : > { %2226 = vrcp.f32 %v1438_v10 }
 0x528   : > { %v2227_v12 = vpop.eup %2226 }
 0x529   : > { %v1440_v13 = vmul.f32 %v2227_v12, %v2219_v45  ;;  %v1995_v45 = vld [vmem:[#allocation8 + $0x88] sm:$0xf0] }
 0x52a   : > { %v1998_v48 = vor.u32 %v2111_v44, %v1995_v45 }
 0x52b   : > { %v1441_v14 = vpack.c.bf16 %v1440_v13, %v1440_v13 }
 0x52d   : > { %2010 = vmatmul.msk.bf16.vlgmr.msrb.gmra.mxu0 %vm860_vm3, %v1441_v14 }
 0x57a   : > { %v1117_v37 = vpop.f32.mrf.mxu0 }
 0x57b   : > { %v1121_v42 = vpack.c.bf16 %v1117_v37, %v1117_v37 }
 0x57d   : > { %1967 = vmatmul.msk.bf16.vlgmr.msrb.gmra.mxu1 %vm839_vm1, %v1121_v42  ;;  %1968 = vmatmul.msk.bf16.vlgmr.msrb.gmra.mxu2 %vm839_vm1, %v1121_v42 }
 0x57e   : > { %1384 = vmatpush.bf16.msrb.mxu1 %v2002_v39  ;;  %1397 = vmatpush.bf16.msrb.mxu2 %v2006_v40 }
 0x582   : > { %v1119_v11 = vpop.f32.mrf.mxu0  ;;  %1385 = vmatpush.bf16.msrb.mxu1 %v1994_v47  ;;  %1398 = vmatpush.bf16.msrb.mxu2 %v1998_v48 }
 0x58a   : > { %v1234_v56 = vpop.f32.mrf.mxu0 }
 0x58b   : > { %v1238_v59 = vpack.c.bf16 %v1234_v56, %v1234_v56 }
 0x58d   : > { %1987 = vmatmul.msk.bf16.vlgmr.msra.gmra.mxu1 %vm839_vm1, %v1238_v59  ;;  %1988 = vmatmul.msk.bf16.vlgmr.msra.gmra.mxu2 %vm839_vm1, %v1238_v59 }
 0x58e   : > { %1501 = vmatpush.bf16.msra.mxu1 %v2022_v57  ;;  %1514 = vmatpush.bf16.msra.mxu2 %v2026_v58 }
 0x592   : > { %v1236_v3 = vpop.f32.mrf.mxu0  ;;  %1502 = vmatpush.bf16.msra.mxu1 %v2014_v63  ;;  %1515 = vmatpush.bf16.msra.mxu2 %v2018_v2 }
 0x59a   : > { %v1345_v5 = vpop.f32.mrf.mxu0 }
 0x59b   : > { %v1349_v6 = vpack.c.bf16 %v1345_v5, %v1345_v5 }
 0x59d   : > { %2007 = vmatmul.msk.bf16.vlgmr.msrb.gmra.mxu1 %vm839_vm1, %v1349_v6  ;;  %2008 = vmatmul.msk.bf16.vlgmr.msrb.gmra.mxu2 %vm839_vm1, %v1349_v6 }
 0x5a2   : > { %v1347_v7 = vpop.f32.mrf.mxu0 }
 0x5aa   : > { %v1462_v8 = vpop.f32.mrf.mxu0 }
 0x5ab   : > { %v1466_v51 = vpack.c.bf16 %v1462_v8, %v1462_v8 }
 0x5ad   : > { %2027 = vmatmul.msk.bf16.vlgmr.msra.gmra.mxu1 %vm839_vm1, %v1466_v51  ;;  %2028 = vmatmul.msk.bf16.vlgmr.msra.gmra.mxu2 %vm839_vm1, %v1466_v51 }
 0x5b2   : > { %v1464_v4 = vpop.f32.mrf.mxu0 }
 0x5fa   : > { %v1159_v9 = vpop.f32.mrf.mxu1 }
 0x5fb   : > { %v1176_v19 = vadd.f32 %v1159_v9, %v1049_v1 }
 0x600   : > { %v1172_v53 = vpop.f32.mrf.mxu2 }
 0x601   : > { %v1177_v27 = vadd.f32 %v1172_v53, %v1062_v22 }
 0x602   : > { %v1161_v10 = vpop.f32.mrf.mxu1 }
 0x608   : > { %v1174_v12 = vpop.f32.mrf.mxu2 }
 0x60a   : > { %v1276_v13 = vpop.f32.mrf.mxu1 }
 0x60b   : > { %v1293_v38 = vadd.f32 %v1276_v13, %v1176_v19 }
 0x610   : > { %v1289_v14 = vpop.f32.mrf.mxu2 }
 0x611   : > { %v1294_v30 = vadd.f32 %v1289_v14, %v1177_v27 }
 0x612   : > { %v1278_v15 = vpop.f32.mrf.mxu1 }
 0x618   : > { %v1291_v24 = vpop.f32.mrf.mxu2 }
 0x61a   : > { %v1387_v16 = vpop.f32.mrf.mxu1 }
 0x61b   : > { %v1404_v23 = vadd.f32 %v1387_v16, %v1293_v38 }
 0x620   : > { %v1400_v17 = vpop.f32.mrf.mxu2 }
 0x621   : > { %v1405_v49 = vadd.f32 %v1400_v17, %v1294_v30 }
 0x622   : > { %v1389_v18 = vpop.f32.mrf.mxu1 }
 0x628   : > { %v1402_v21 = vpop.f32.mrf.mxu2 }
 0x62a   : > { %v1504_v26 = vpop.f32.mrf.mxu1 }
 0x62b   : > { %v1521_v28 = vadd.f32 %v1504_v26, %v1404_v23 }
 0x62d   : > { %v1529_v46 = vadd.f32 %v1525_v25, %v1521_v28 }
 0x62f   : > { %1531 = vst [vmem:[%s290_s9] sm:$0xff] %v1529_v46 }
 0x630   : > { %v1517_v29 = vpop.f32.mrf.mxu2 }
 0x631   : > { %v1522_v0 = vadd.f32 %v1517_v29, %v1405_v49 }
 0x632   : > { %v1506_v32 = vpop.f32.mrf.mxu1 }
 0x633   : > { %v1530_v34 = vadd.f32 %v1526_v31, %v1522_v0 }
 0x635   : > { %1532 = vst.msk [vmem:[%s290_s9 + $0x8] sm:$0xff] %vm692_vm0, %v1530_v34 }
 0x636   : > { %2375 = shalt.err (!%p2372_p9)
}
 0x637   : > { %2134 = dma.vmem_to_hbm [thread:$0]  (%p2540_p13), %s1548_s11, 256, %s1550_s12, %s1534_s25  }
 0x638   : > { %v1519_v35 = vpop.f32.mrf.mxu2 }
 0x639 PF: > { %s1561_s7 = sand.u32 1, %s2410_s18   ;;  %p2796_p10 = scmp.ge.s32.totalorder %s2422_s21, 2 }
 0x63a   : > { %s1562_s17 = scalar_lea.sflag [#allocation4], %s1561_s7 }
 0x63b   : > { %p2151_p11 = pnand %p2796_p10, %p2545_p4 }
 0x63d   : > { %p2152_p0 = pneg %p2151_p11 }
 0x63f   : > { %2405 = dma.done.wait (%p2152_p0), %s1562_s17, 256  }
 0x640   : > { %2407 = vsyncadd (%p2152_p0), %s1562_s17, 4294967040  ;;  %p20_p2 = scmp.ge.s32.totalorder %s2520_s24, 4   ;;  %s2797_s18 = smov %s2414_s19 }
 0x641   : > { %s2798_s19 = smov %s2418_s20  ;;  %s2799_s20 = smov %s2532_s29 }
 0x642   : > { %s2800_s21 = smov %s2520_s24  ;;  %22 = sbr.rel (!%p20_p2) target bundleno = 7 (0x7), region = 102 }
 0x647   :  { %1568 = vsyncpa [#allocation3], 1 }
 0x648   :  { %1570 = vsyncpa [#allocation3 + $0x1], 1 }
 0x649   :  { %1571 = vsyncpa [#allocation6], 1 }
 0x64a   :  { %1572 = vsyncpa [#allocation9], 1 }
 0x64b   :  { %1573 = vsyncpa [#allocation4], 1 }
 0x64c   :  { %1575 = vsyncpa [#allocation4 + $0x1], 1 }

</bundles_post_ra>
